<compile_context>
chip_gen: v7x
topology: tpu7x:2x2x1
jax: 0.10.0
libtpu: 0.0.40
codegen_flags: <defaults>
</compile_context>

<pallas_src>
import math

import jax
import jax.numpy as jnp
from jax.experimental import pallas as pl
from jax.experimental.pallas import tpu as pltpu

HEAD_DIM = 128
EPS = float(jnp.finfo(jnp.float32).eps)   # F.rms_norm(eps=None) -> finfo(f32).eps
VMEM_LIMIT = 64 * 1024 * 1024


# ---------------------------------------------------------------- helpers ----
def _rms_norm(x):
    ms = jnp.mean(jnp.square(x), axis=-1, keepdims=True)
    return x * jax.lax.rsqrt(ms + EPS)


def _apply_rotary(x, cos, sin):
    # x: (..., D); cos/sin broadcastable to x, lane-dense (T, D) with the sign of the
    # second half already folded into sin:  y = x * cos + rot_half(x) * sin.
    half = x.shape[-1] // 2
    xr = jnp.concatenate([x[..., half:], x[..., :half]], axis=-1)
    return x * cos + xr * sin


def rotary_tables(seq_len, head_dim):
    # (T, head_dim//2) tables, exactly as the torch Rotary module builds them.
    quarter = head_dim // 4
    angular_freq = (1.0 / 1024.0) ** jnp.linspace(0.0, 1.0, quarter,
                                                  dtype=jnp.float32)
    angular_freq = jnp.concatenate(
        [angular_freq, jnp.zeros((quarter,), jnp.float32)])
    t = jnp.arange(seq_len, dtype=jnp.float32)
    theta = t[:, None] * angular_freq[None, :]
    return jnp.cos(theta), jnp.sin(theta)


def rotary_tables_lane_dense(seq_len, head_dim):
    # Full-width (T, head_dim) tables: cos duplicated, sin with the second-half sign
    # folded in, so the kernel applies rotary with two lane-dense multiplies.
    cos, sin = rotary_tables(seq_len, head_dim)
    return (jnp.concatenate([cos, cos], axis=-1),
            jnp.concatenate([sin, -sin], axis=-1))


def _pick_block(total, candidates, fits=lambda b: True):
    for c in candidates:
        if c <= total and total % c == 0 and fits(c):
            return c
    return total   # fall back to a single full block


# ---------------------------------------------------------------- kernels ----
def _fused_kernel(xq_ref, xkv_ref, qw_ref, kvw_ref, cosq_ref, sinq_ref,
                  cosk_ref, sink_ref, cw_ref, o_ref):
    """heads == 1: KV proj + rotary + per-token attention + c_proj, fully fused."""
    D = HEAD_DIM
    xq = xq_ref[...]                     # (tq_blk, dim)
    xkv = xkv_ref[...]                   # (tq_blk * cpt, dim)
    t = xq.shape[0]
    cpt = xkv.shape[0] // t

    # KV projection (lambda_factor already folded into the V columns of the weight).
    kv = jnp.dot(xkv, kvw_ref[...], preferred_element_type=jnp.float32)   # (t*cpt, 2D)
    k = _apply_rotary(_rms_norm(kv[:, :D]), cosk_ref[...], sink_ref[...])
    v = kv[:, D:]

    # Q projection.
    q = jnp.dot(xq, qw_ref[...], preferred_element_type=jnp.float32)      # (t, D)
    q = _apply_rotary(_rms_norm(q), cosq_ref[...], sinq_ref[...])

    # Per-token cross attention over its cpt byte keys (torch .view grouping, heads==1).
    kr = k.reshape(t, cpt, D)
    vr = v.reshape(t, cpt, D)
    qr = q[:, None, :]                                                    # (t, 1, D)
    s = jnp.einsum('tqd,tcd->tqc', qr, kr,
                   preferred_element_type=jnp.float32) * (1.0 / math.sqrt(D))
    s = s - jnp.max(s, axis=-1, keepdims=True)
    e = jnp.exp(s)
    w = e / jnp.sum(e, axis=-1, keepdims=True)
    y = jnp.einsum('tqc,tcd->tqd', w, vr,
                   preferred_element_type=jnp.float32)[:, 0, :]            # (t, D)

    # Output projection.
    o_ref[...] = jnp.dot(y, cw_ref[...], preferred_element_type=jnp.float32)


def _kv_kernel(xkv_ref, kvw_ref, cos_ref, sin_ref, k_ref, v_ref):
    """heads > 1 path, pass 1: KV projection + rms-norm(k) + rotary(k)."""
    x = xkv_ref[...]                     # (tkv_blk, dim)
    w = kvw_ref[...]                     # (dim, 2*hdim), pre-transposed, lambda folded
    hdim = w.shape[1] // 2
    heads = hdim // HEAD_DIM
    t = x.shape[0]
    kv = jnp.dot(x, w, preferred_element_type=jnp.float32)                # (t, 2*hdim)
    k = kv[:, :hdim].reshape(t, heads, HEAD_DIM)
    k = _apply_rotary(_rms_norm(k), cos_ref[...][:, None, :], sin_ref[...][:, None, :])
    k_ref[...] = k.reshape(t, hdim)
    v_ref[...] = kv[:, hdim:]


def _attn_kernel(xq_ref, qw_ref, cos_ref, sin_ref, k_ref, v_ref, cw_ref, o_ref):
    """heads > 1 path, pass 2: Q projection + attention + output projection."""
    x = xq_ref[...]                      # (tq_blk, dim)
    qw = qw_ref[...]                     # (dim, hdim)
    hdim = qw.shape[1]
    heads = hdim // HEAD_DIM
    t = x.shape[0]
    cpt = k_ref.shape[2]

    q = jnp.dot(x, qw, preferred_element_type=jnp.float32).reshape(t, heads, HEAD_DIM)
    q = _apply_rotary(_rms_norm(q), cos_ref[...][:, None, :], sin_ref[...][:, None, :])
    q = q.transpose(1, 0, 2).reshape(heads * t, 1, HEAD_DIM)              # (H*t, 1, D)

    k = k_ref[...].reshape(heads * t, cpt, HEAD_DIM)
    v = v_ref[...].reshape(heads * t, cpt, HEAD_DIM)
    s = jnp.einsum('bqd,bcd->bqc', q, k,
                   preferred_element_type=jnp.float32) * (1.0 / math.sqrt(HEAD_DIM))
    s = s - jnp.max(s, axis=-1, keepdims=True)
    e = jnp.exp(s)
    w = e / jnp.sum(e, axis=-1, keepdims=True)
    y = jnp.einsum('bqc,bcd->bqd', w, v, preferred_element_type=jnp.float32)
    y = y.reshape(heads, t, HEAD_DIM).transpose(1, 0, 2).reshape(t, hdim)
    o_ref[...] = jnp.dot(y, cw_ref[...], preferred_element_type=jnp.float32)


# ---------------------------------------------------------------- wrapper ----
def byte_mixin_cross_attn(token_embs, byte_embs, params):
    assert token_embs.shape[0] == 1 and byte_embs.shape[0] == 1, \
        "Must use batch size = 1 (mirrors the torch assertion)"
    xq = token_embs[0].astype(jnp.float32)    # (Tq, dim)
    xkv = byte_embs[0].astype(jnp.float32)    # (Tkv, dim)
    tq, dim = xq.shape
    tkv, dkv = xkv.shape
    assert dkv == dim
    assert tkv % tq == 0, "Tkv must be a multiple of Tq (bytes_per_token grouping)"
    assert dim >= HEAD_DIM
    cpt = tkv // tq                           # chars_per_token (= bytes_per_token)
    heads = dim // HEAD_DIM
    hdim = heads * HEAD_DIM

    # Pre-transposed weights ((in, out) layout) with lambda folded into the V half.
    lam = jnp.asarray(params["lambda_factor"], jnp.float32)
    kv_w_flat = params["kv_w"].reshape(2 * hdim, dim).astype(jnp.float32)
    kv_w_t = jnp.concatenate([kv_w_flat[:hdim].T, (lam * kv_w_flat[hdim:]).T], axis=1)
    q_w_t = params["q_w"].astype(jnp.float32).T       # (dim, hdim)
    c_w_t = params["c_proj_w"].astype(jnp.float32).T  # (hdim, dim)

    cos_k, sin_k = rotary_tables_lane_dense(tkv, HEAD_DIM)   # (Tkv, 128)
    cos_q, sin_q = rotary_tables_lane_dense(tq, HEAD_DIM)    # (Tq, 128)

    cparams = pltpu.CompilerParams(dimension_semantics=("parallel",),
                                   vmem_limit_bytes=VMEM_LIMIT)
    blk_candidates = (256, 128, 64, 32, 16, 8)

    if heads == 1:
        # ------- fully fused path: one pallas_call, no K/V HBM round trip -------
        def fits(b):   # rough double-buffered f32 activation bytes per grid step
            return 8 * b * cpt * (dim + 2 * hdim) <= 24 * 1024 * 1024
        tq_blk = _pick_block(tq, blk_candidates, fits)
        tkv_blk = tq_blk * cpt
        out = pl.pallas_call(
            _fused_kernel,
            grid=(tq // tq_blk,),
            in_specs=[
                pl.BlockSpec((tq_blk, dim), lambda i: (i, 0)),
                pl.BlockSpec((tkv_blk, dim), lambda i: (i, 0)),
                pl.BlockSpec((dim, hdim), lambda i: (0, 0)),
                pl.BlockSpec((dim, 2 * hdim), lambda i: (0, 0)),
                pl.BlockSpec((tq_blk, HEAD_DIM), lambda i: (i, 0)),
                pl.BlockSpec((tq_blk, HEAD_DIM), lambda i: (i, 0)),
                pl.BlockSpec((tkv_blk, HEAD_DIM), lambda i: (i, 0)),
                pl.BlockSpec((tkv_blk, HEAD_DIM), lambda i: (i, 0)),
                pl.BlockSpec((hdim, dim), lambda i: (0, 0)),
            ],
            out_specs=pl.BlockSpec((tq_blk, dim), lambda i: (i, 0)),
            out_shape=jax.ShapeDtypeStruct((tq, dim), jnp.float32),
            compiler_params=cparams,
        )(xq, xkv, q_w_t, kv_w_t, cos_q, sin_q, cos_k, sin_k, c_w_t)
        return out[None]

    # ------- heads > 1: torch .view() scrambles heads across byte rows, so keep a
    #         KV pass -> raw row-major reshape (the .view) -> attention pass. -------
    def kv_fits(b):
        act = 2 * 4 * b * (dim + 4 * hdim)          # in + kv + k_out + v_out, x2 buffers
        wts = 2 * 4 * dim * 2 * hdim
        return act + wts <= 48 * 1024 * 1024
    tkv_blk = _pick_block(tkv, (512,) + blk_candidates, kv_fits)
    k_flat, v_flat = pl.pallas_call(
        _kv_kernel,
        grid=(tkv // tkv_blk,),
        in_specs=[
            pl.BlockSpec((tkv_blk, dim), lambda i: (i, 0)),
            pl.BlockSpec((dim, 2 * hdim), lambda i: (0, 0)),
            pl.BlockSpec((tkv_blk, HEAD_DIM), lambda i: (i, 0)),
            pl.BlockSpec((tkv_blk, HEAD_DIM), lambda i: (i, 0)),
        ],
        out_specs=[
            pl.BlockSpec((tkv_blk, hdim), lambda i: (i, 0)),
            pl.BlockSpec((tkv_blk, hdim), lambda i: (i, 0)),
        ],
        out_shape=[
            jax.ShapeDtypeStruct((tkv, hdim), jnp.float32),
            jax.ShapeDtypeStruct((tkv, hdim), jnp.float32),
        ],
        compiler_params=cparams,
    )(xkv, kv_w_t, cos_k, sin_k)

    # Glue: reproduce the torch `.view()` raw memory reinterpretation exactly:
    # contiguous (Tkv, H, D) reinterpreted row-major as (H, Tq, cpt, D).
    k_r = k_flat.reshape(heads, tq, cpt, HEAD_DIM)
    v_r = v_flat.reshape(heads, tq, cpt, HEAD_DIM)

    def attn_fits(b):   # double-buffered f32 K + V blocks dominate (v7x: 64 MiB VMEM)
        return 16 * heads * b * cpt * HEAD_DIM <= 24 * 1024 * 1024
    tq_blk = _pick_block(tq, blk_candidates, attn_fits)
    out = pl.pallas_call(
        _attn_kernel,
        grid=(tq // tq_blk,),
        in_specs=[
            pl.BlockSpec((tq_blk, dim), lambda i: (i, 0)),
            pl.BlockSpec((dim, hdim), lambda i: (0, 0)),
            pl.BlockSpec((tq_blk, HEAD_DIM), lambda i: (i, 0)),
            pl.BlockSpec((tq_blk, HEAD_DIM), lambda i: (i, 0)),
            pl.BlockSpec((heads, tq_blk, cpt, HEAD_DIM), lambda i: (0, i, 0, 0)),
            pl.BlockSpec((heads, tq_blk, cpt, HEAD_DIM), lambda i: (0, i, 0, 0)),
            pl.BlockSpec((hdim, dim), lambda i: (0, 0)),
        ],
        out_specs=pl.BlockSpec((tq_blk, dim), lambda i: (i, 0)),
        out_shape=jax.ShapeDtypeStruct((tq, dim), jnp.float32),
        compiler_params=cparams,
    )(xq, q_w_t, cos_q, sin_q, k_r, v_r, c_w_t)
    return out[None]


# ------------------------------------------------------------- param init ----
def init_params(key, dim):
    heads = dim // HEAD_DIM
    hdim = heads * HEAD_DIM
    k1, k2, k3 = jax.random.split(key, 3)
    b_qkv = math.sqrt(3.0) * 0.5 * dim ** -0.5     # CrossAttention q_w / kv_w
    b_proj = math.sqrt(3.0) * 0.5 * hdim ** -0.5   # CastedLinear c_proj
    return dict(
        q_w=jax.random.uniform(k1, (hdim, dim), jnp.float32, -b_qkv, b_qkv),
        kv_w=jax.random.uniform(k2, (2, hdim, dim), jnp.float32, -b_qkv, b_qkv),
        c_proj_w=jax.random.uniform(k3, (dim, hdim), jnp.float32, -b_proj, b_proj),
        lambda_factor=0.5,
    )


# --------------------------------------------------------- pure-JAX check ----
def _ref_rotary(x, cos, sin):
    # Verbatim torch Rotary formula with (T, D//2) tables (independent of the
    # lane-dense formulation used inside the kernels).
    half = x.shape[-1] // 2
    x1, x2 = x[..., :half], x[..., half:]
    c, s = cos[:, None, :], sin[:, None, :]
    return jnp.concatenate([x1 * c + x2 * s, -x1 * s + x2 * c], axis=-1)


def reference(token_embs, byte_embs, params):
    xq, xkv = token_embs[0], byte_embs[0]
    tq, dim = xq.shape
    tkv, _ = xkv.shape
    heads = dim // HEAD_DIM
    hdim = heads * HEAD_DIM
    cpt = tkv // tq
    kv = xkv @ params["kv_w"].reshape(2 * hdim, dim).T
    k = kv[:, :hdim].reshape(tkv, heads, HEAD_DIM)
    v = kv[:, hdim:].reshape(tkv, heads, HEAD_DIM)
    q = (xq @ params["q_w"].T).reshape(tq, heads, HEAD_DIM)
    cos_k, sin_k = rotary_tables(tkv, HEAD_DIM)
    cos_q, sin_q = rotary_tables(tq, HEAD_DIM)
    q = _ref_rotary(_rms_norm(q), cos_q, sin_q)
    k = _ref_rotary(_rms_norm(k), cos_k, sin_k)
    v = params["lambda_factor"] * v
    qh = q.transpose(1, 0, 2)[:, :, None, :]            # (H, Tq, 1, D)
    kr = k.reshape(heads, tq, cpt, HEAD_DIM)             # torch .view semantics
    vr = v.reshape(heads, tq, cpt, HEAD_DIM)
    s = jnp.einsum("hqod,hqcd->hqoc", qh, kr) / math.sqrt(HEAD_DIM)
    w = jax.nn.softmax(s, axis=-1)
    y = jnp.einsum("hqoc,hqcd->hqod", w, vr)[:, :, 0, :]
    y = y.transpose(1, 0, 2).reshape(tq, hdim)
    return (y @ params["c_proj_w"].T)[None]


# -------------------------------------------------------------------- main ----
if __name__ == "__main__":
    # Config 1: default ModelDims scaled down -> num_heads = dim // 128 = 1 (fused path).
    dim, tq, bpt = 128, 16, 16
    tkv = tq * bpt
    kp, kt, kb = jax.random.split(jax.random.PRNGKey(0), 3)
    params = init_params(kp, dim)
    token_embs = jax.random.normal(kt, (1, tq, dim), jnp.float32)
    byte_embs = jax.random.normal(kb, (1, tkv, dim), jnp.float32)

    out = jax.block_until_ready(byte_mixin_cross_attn(token_embs, byte_embs, params))
    ref = reference(token_embs, byte_embs, params)
    assert out.shape == (1, tq, dim)
    assert jnp.allclose(out, ref, atol=2e-4, rtol=2e-4), \
        float(jnp.max(jnp.abs(out - ref)))

    # Config 2: dim = 256 -> num_heads = 2 (two-kernel fallback path, torch .view scrambling).
    dim2 = 256
    kp2, kt2, kb2 = jax.random.split(jax.random.PRNGKey(1), 3)
    params2 = init_params(kp2, dim2)
    token_embs2 = jax.random.normal(kt2, (1, tq, dim2), jnp.float32)
    byte_embs2 = jax.random.normal(kb2, (1, tkv, dim2), jnp.float32)

    out2 = jax.block_until_ready(byte_mixin_cross_attn(token_embs2, byte_embs2, params2))
    ref2 = reference(token_embs2, byte_embs2, params2)
    assert out2.shape == (1, tq, dim2)
    assert jnp.allclose(out2, ref2, atol=2e-4, rtol=2e-4), \
        float(jnp.max(jnp.abs(out2 - ref2)))

    print("KERNEL_OK")
</pallas_src>

<mosaic_0001>
module attributes {stable_mosaic.version = 11 : i64} {
  func.func @_fused_kernel(%arg0: i32, %arg1: memref<16x128xf32, #tpu.memory_space<vmem>>, %arg2: memref<256x128xf32, #tpu.memory_space<vmem>>, %arg3: memref<128x128xf32, #tpu.memory_space<vmem>>, %arg4: memref<128x256xf32, #tpu.memory_space<vmem>>, %arg5: memref<16x128xf32, #tpu.memory_space<vmem>>, %arg6: memref<16x128xf32, #tpu.memory_space<vmem>>, %arg7: memref<256x128xf32, #tpu.memory_space<vmem>>, %arg8: memref<256x128xf32, #tpu.memory_space<vmem>>, %arg9: memref<128x128xf32, #tpu.memory_space<vmem>>, %arg10: memref<16x128xf32, #tpu.memory_space<vmem>>) attributes {dimension_semantics = [#tpu.dimension_semantics<parallel>], iteration_bounds = array<i64: 1>, scalar_prefetch = 0 : i64, scratch_operands = 0 : i64, tpu.core_type = #tpu.core_type<tc>, window_params = [{transform_indices = @transform_0, window_bounds = array<i64: 16, 128>}, {transform_indices = @transform_1, window_bounds = array<i64: 256, 128>}, {pipeline_mode = #tpu.pipeline_mode<synchronous>, transform_indices = @transform_2, window_bounds = array<i64: 128, 128>}, {pipeline_mode = #tpu.pipeline_mode<synchronous>, transform_indices = @transform_3, window_bounds = array<i64: 128, 256>}, {transform_indices = @transform_4, window_bounds = array<i64: 16, 128>}, {transform_indices = @transform_5, window_bounds = array<i64: 16, 128>}, {transform_indices = @transform_6, window_bounds = array<i64: 256, 128>}, {transform_indices = @transform_7, window_bounds = array<i64: 256, 128>}, {pipeline_mode = #tpu.pipeline_mode<synchronous>, transform_indices = @transform_8, window_bounds = array<i64: 128, 128>}, {transform_indices = @transform_9, window_bounds = array<i64: 16, 128>}]} {
    %c0 = arith.constant 0 : index
    %c0_0 = arith.constant 0 : index
    %0 = vector.load %arg1[%c0, %c0_0] : memref<16x128xf32, #tpu.memory_space<vmem>>, vector<16x128xf32>
    %c0_1 = arith.constant 0 : index
    %c0_2 = arith.constant 0 : index
    %1 = vector.load %arg2[%c0_1, %c0_2] : memref<256x128xf32, #tpu.memory_space<vmem>>, vector<256x128xf32>
    %c0_3 = arith.constant 0 : index
    %c0_4 = arith.constant 0 : index
    %2 = vector.load %arg4[%c0_3, %c0_4] : memref<128x256xf32, #tpu.memory_space<vmem>>, vector<128x256xf32>
    %cst = arith.constant dense<0.000000e+00> : vector<256x256xf32>
    %3 = tpu.matmul %1, %2, %cst {dimension_numbers = #tpu.dot_dimension_numbers<[1], [0], [0], [1], [0, 0, 1, 1], [], []>} : vector<256x128xf32>, vector<128x256xf32>, vector<256x256xf32> -> vector<256x256xf32>
    %4 = vector.extract_strided_slice %3 {offsets = [0, 0], sizes = [256, 128], strides = [1, 1]} : vector<256x256xf32> to vector<256x128xf32>
    %5 = arith.mulf %4, %4 : vector<256x128xf32>
    %cst_5 = arith.constant dense<0.000000e+00> : vector<256xf32>
    %6 = vector.multi_reduction <add>, %5, %cst_5 [1] : vector<256x128xf32> to vector<256xf32>
    %7 = vector.shape_cast %6 : vector<256xf32> to vector<256x1xf32>
    %cst_6 = arith.constant 1.280000e+02 : f32
    %8 = vector.broadcast %cst_6 : f32 to vector<256x1xf32>
    %9 = arith.divf %7, %8 : vector<256x1xf32>
    %cst_7 = arith.constant 1.1920929E-7 : f32
    %10 = vector.broadcast %cst_7 : f32 to vector<256x1xf32>
    %11 = arith.addf %9, %10 : vector<256x1xf32>
    %12 = math.rsqrt %11 : vector<256x1xf32>
    %13 = vector.broadcast %12 : vector<256x1xf32> to vector<256x128xf32>
    %14 = arith.mulf %4, %13 : vector<256x128xf32>
    %c0_8 = arith.constant 0 : index
    %c0_9 = arith.constant 0 : index
    %15 = vector.load %arg7[%c0_8, %c0_9] : memref<256x128xf32, #tpu.memory_space<vmem>>, vector<256x128xf32>
    %c0_10 = arith.constant 0 : index
    %c0_11 = arith.constant 0 : index
    %16 = vector.load %arg8[%c0_10, %c0_11] : memref<256x128xf32, #tpu.memory_space<vmem>>, vector<256x128xf32>
    %17 = vector.extract_strided_slice %14 {offsets = [0, 64], sizes = [256, 64], strides = [1, 1]} : vector<256x128xf32> to vector<256x64xf32>
    %18 = vector.extract_strided_slice %14 {offsets = [0, 0], sizes = [256, 64], strides = [1, 1]} : vector<256x128xf32> to vector<256x64xf32>
    %19 = tpu.concatenate %17, %18 in 1 : vector<256x64xf32>, vector<256x64xf32> -> vector<256x128xf32>
    %20 = arith.mulf %14, %15 : vector<256x128xf32>
    %21 = arith.mulf %19, %16 : vector<256x128xf32>
    %22 = arith.addf %20, %21 : vector<256x128xf32>
    %23 = vector.extract_strided_slice %3 {offsets = [0, 128], sizes = [256, 128], strides = [1, 1]} : vector<256x256xf32> to vector<256x128xf32>
    %c0_12 = arith.constant 0 : index
    %c0_13 = arith.constant 0 : index
    %24 = vector.load %arg3[%c0_12, %c0_13] : memref<128x128xf32, #tpu.memory_space<vmem>>, vector<128x128xf32>
    %cst_14 = arith.constant dense<0.000000e+00> : vector<16x128xf32>
    %25 = tpu.matmul %0, %24, %cst_14 {dimension_numbers = #tpu.dot_dimension_numbers<[1], [0], [0], [1], [0, 0, 1, 1], [], []>} : vector<16x128xf32>, vector<128x128xf32>, vector<16x128xf32> -> vector<16x128xf32>
    %26 = arith.mulf %25, %25 : vector<16x128xf32>
    %cst_15 = arith.constant dense<0.000000e+00> : vector<16xf32>
    %27 = vector.multi_reduction <add>, %26, %cst_15 [1] : vector<16x128xf32> to vector<16xf32>
    %28 = vector.shape_cast %27 : vector<16xf32> to vector<16x1xf32>
    %cst_16 = arith.constant 1.280000e+02 : f32
    %29 = vector.broadcast %cst_16 : f32 to vector<16x1xf32>
    %30 = arith.divf %28, %29 : vector<16x1xf32>
    %cst_17 = arith.constant 1.1920929E-7 : f32
    %31 = vector.broadcast %cst_17 : f32 to vector<16x1xf32>
    %32 = arith.addf %30, %31 : vector<16x1xf32>
    %33 = math.rsqrt %32 : vector<16x1xf32>
    %34 = vector.broadcast %33 : vector<16x1xf32> to vector<16x128xf32>
    %35 = arith.mulf %25, %34 : vector<16x128xf32>
    %c0_18 = arith.constant 0 : index
    %c0_19 = arith.constant 0 : index
    %36 = vector.load %arg5[%c0_18, %c0_19] : memref<16x128xf32, #tpu.memory_space<vmem>>, vector<16x128xf32>
    %c0_20 = arith.constant 0 : index
    %c0_21 = arith.constant 0 : index
    %37 = vector.load %arg6[%c0_20, %c0_21] : memref<16x128xf32, #tpu.memory_space<vmem>>, vector<16x128xf32>
    %38 = vector.extract_strided_slice %35 {offsets = [0, 64], sizes = [16, 64], strides = [1, 1]} : vector<16x128xf32> to vector<16x64xf32>
    %39 = vector.extract_strided_slice %35 {offsets = [0, 0], sizes = [16, 64], strides = [1, 1]} : vector<16x128xf32> to vector<16x64xf32>
    %40 = tpu.concatenate %38, %39 in 1 : vector<16x64xf32>, vector<16x64xf32> -> vector<16x128xf32>
    %41 = arith.mulf %35, %36 : vector<16x128xf32>
    %42 = arith.mulf %40, %37 : vector<16x128xf32>
    %43 = arith.addf %41, %42 : vector<16x128xf32>
    %44 = vector.shape_cast %22 : vector<256x128xf32> to vector<16x16x128xf32>
    %45 = vector.shape_cast %23 : vector<256x128xf32> to vector<16x16x128xf32>
    %46 = vector.shape_cast %43 : vector<16x128xf32> to vector<16x1x128xf32>
    "tpu.trace_start"() <{level = 10 : i32, message = "tqd,tcd->tqc"}> : () -> ()
    %cst_22 = arith.constant dense<0.000000e+00> : vector<16x1x16xf32>
    %47 = tpu.matmul %46, %44, %cst_22 {dimension_numbers = #tpu.dot_dimension_numbers<[2], [2], [1], [1], [0, 0, 0, 1, 1, 1], [0], [0]>} : vector<16x1x128xf32>, vector<16x16x128xf32>, vector<16x1x16xf32> -> vector<16x1x16xf32>
    "tpu.trace_stop"() : () -> ()
    %cst_23 = arith.constant 0.0883883461 : f32
    %48 = vector.broadcast %cst_23 : f32 to vector<16x1x16xf32>
    %49 = arith.mulf %47, %48 : vector<16x1x16xf32>
    %cst_24 = arith.constant dense<0xFF800000> : vector<16x1xf32>
    %50 = vector.multi_reduction <maximumf>, %49, %cst_24 [2] : vector<16x1x16xf32> to vector<16x1xf32>
    %51 = vector.shape_cast %50 : vector<16x1xf32> to vector<16x1x1xf32>
    %52 = vector.broadcast %51 : vector<16x1x1xf32> to vector<16x1x16xf32>
    %53 = arith.subf %49, %52 : vector<16x1x16xf32>
    %54 = math.exp %53 : vector<16x1x16xf32>
    %cst_25 = arith.constant dense<0.000000e+00> : vector<16x1xf32>
    %55 = vector.multi_reduction <add>, %54, %cst_25 [2] : vector<16x1x16xf32> to vector<16x1xf32>
    %56 = vector.shape_cast %55 : vector<16x1xf32> to vector<16x1x1xf32>
    %57 = vector.broadcast %56 : vector<16x1x1xf32> to vector<16x1x16xf32>
    %58 = arith.divf %54, %57 : vector<16x1x16xf32>
    "tpu.trace_start"() <{level = 10 : i32, message = "tqc,tcd->tqd"}> : () -> ()
    %cst_26 = arith.constant dense<0.000000e+00> : vector<16x1x128xf32>
    %59 = tpu.matmul %58, %45, %cst_26 {dimension_numbers = #tpu.dot_dimension_numbers<[2], [1], [1], [2], [0, 0, 0, 1, 1, 2], [0], [0]>} : vector<16x1x16xf32>, vector<16x16x128xf32>, vector<16x1x128xf32> -> vector<16x1x128xf32>
    "tpu.trace_stop"() : () -> ()
    %60 = vector.shape_cast %59 : vector<16x1x128xf32> to vector<16x128xf32>
    %c0_27 = arith.constant 0 : index
    %c0_28 = arith.constant 0 : index
    %61 = vector.load %arg9[%c0_27, %c0_28] : memref<128x128xf32, #tpu.memory_space<vmem>>, vector<128x128xf32>
    %cst_29 = arith.constant dense<0.000000e+00> : vector<16x128xf32>
    %62 = tpu.matmul %60, %61, %cst_29 {dimension_numbers = #tpu.dot_dimension_numbers<[1], [0], [0], [1], [0, 0, 1, 1], [], []>} : vector<16x128xf32>, vector<128x128xf32>, vector<16x128xf32> -> vector<16x128xf32>
    %c0_30 = arith.constant 0 : index
    %c0_31 = arith.constant 0 : index
    %63 = vector.load %arg10[%c0_30, %c0_31] : memref<16x128xf32, #tpu.memory_space<vmem>>, vector<16x128xf32>
    tpu.vector_store %arg10[%c0_30, %c0_31], %62 {strides = array<i32>} : memref<16x128xf32, #tpu.memory_space<vmem>>, vector<16x128xf32>,
    return
  }
  func.func @transform_0(%arg0: i32) -> (i32, i32) {
    %c0_i32 = arith.constant 0 : i32
    %c0_i32_0 = arith.constant 0 : i32
    return %arg0, %c0_i32 : i32, i32
  }
  func.func @transform_1(%arg0: i32) -> (i32, i32) {
    %c0_i32 = arith.constant 0 : i32
    %c0_i32_0 = arith.constant 0 : i32
    return %arg0, %c0_i32 : i32, i32
  }
  func.func @transform_2(%arg0: i32) -> (i32, i32) {
    %c0_i32 = arith.constant 0 : i32
    %c0_i32_0 = arith.constant 0 : i32
    %c0_i32_1 = arith.constant 0 : i32
    return %c0_i32, %c0_i32_0 : i32, i32
  }
  func.func @transform_3(%arg0: i32) -> (i32, i32) {
    %c0_i32 = arith.constant 0 : i32
    %c0_i32_0 = arith.constant 0 : i32
    %c0_i32_1 = arith.constant 0 : i32
    return %c0_i32, %c0_i32_0 : i32, i32
  }
  func.func @transform_4(%arg0: i32) -> (i32, i32) {
    %c0_i32 = arith.constant 0 : i32
    %c0_i32_0 = arith.constant 0 : i32
    return %arg0, %c0_i32 : i32, i32
  }
  func.func @transform_5(%arg0: i32) -> (i32, i32) {
    %c0_i32 = arith.constant 0 : i32
    %c0_i32_0 = arith.constant 0 : i32
    return %arg0, %c0_i32 : i32, i32
  }
  func.func @transform_6(%arg0: i32) -> (i32, i32) {
    %c0_i32 = arith.constant 0 : i32
    %c0_i32_0 = arith.constant 0 : i32
    return %arg0, %c0_i32 : i32, i32
  }
  func.func @transform_7(%arg0: i32) -> (i32, i32) {
    %c0_i32 = arith.constant 0 : i32
    %c0_i32_0 = arith.constant 0 : i32
    return %arg0, %c0_i32 : i32, i32
  }
  func.func @transform_8(%arg0: i32) -> (i32, i32) {
    %c0_i32 = arith.constant 0 : i32
    %c0_i32_0 = arith.constant 0 : i32
    %c0_i32_1 = arith.constant 0 : i32
    return %c0_i32, %c0_i32_0 : i32, i32
  }
  func.func @transform_9(%arg0: i32) -> (i32, i32) {
    %c0_i32 = arith.constant 0 : i32
    %c0_i32_0 = arith.constant 0 : i32
    return %arg0, %c0_i32 : i32, i32
  }
}

</mosaic_0001>

<bundles_post_ra>
// kernel: tpu_custom_call.1
= control target key start
LH: loop header
LB: loop body
LE: loop exit
PB: predicated region body
PF: predicated region fallthrough
CT: control target
= control target key end

     0   :  { %14 = vsyncpa [#allocation3], 0  ;;  %s5984_s0 = inlined_call_operand.hbm [shape: f32[16,128], index: 0, kind: input, shape index: {}]   ;;  %s5985_s1 = inlined_call_operand.hbm [shape: f32[256,128], index: 1, kind: input, shape index: {}]   ;;  %s5986_s2 = inlined_call_operand.hbm [shape: f32[128,128], index: 2, kind: input, shape index: {}]   ;;  %s5987_s3 = inlined_call_operand.hbm [shape: f32[128,256], index: 3, kind: input, shape index: {}]   ;;  %s5988_s4 = inlined_call_operand.hbm [shape: f32[16,128], index: 4, kind: input, shape index: {}]   ;;  %s5989_s5 = inlined_call_operand.hbm [shape: f32[16,128], index: 5, kind: input, shape index: {}]   ;;  %s5990_s6 = inlined_call_operand.hbm [shape: f32[256,128], index: 6, kind: input, shape index: {}]   ;;  %s5991_s7 = inlined_call_operand.hbm [shape: f32[256,128], index: 7, kind: input, shape index: {}]   ;;  %s5992_s8 = inlined_call_operand.hbm [shape: f32[128,128], index: 8, kind: input, shape index: {}]   ;;  %s5993_s9 = inlined_call_operand.hbm [shape: f32[16,128], index: 9, kind: output, shape index: {}]  }
   0x1   :  { %15 = vsyncpa [#allocation6], 0 }
   0x2   :  { %16 = vsyncpa [#allocation9], 0 }
   0x3   :  { %17 = vsyncpa [#allocation12], 0 }
   0x4   :  { %18 = vsyncpa [#allocation15], 0 }
   0x5   :  { %19 = vsyncpa [#allocation4], 0  ;;  %s4896_s30 = smov [#allocation5]   ;;  %s4897_s11 = smov [#allocation8]  }
   0x6   :  { %s37_s10 = sshll.u32 %s4896_s30, 4  ;;  %s61_s12 = sshll.u32 %s4897_s11, 4  ;;  %s38_s10 = int_to_ptr.vmem [resolvable:$true] %s37_s10  ;;  %s4965_s12 = int_to_ptr.vmem [resolvable:$true] %s61_s12 }
   0x7   :  { %s4664_s15 = scalar_lea.hbm %s5985_s1, 4096 }
   0x8   :  { %p4665_p0 = scmp.ne.s32.totalorder %s5985_s1, %s4664_s15  ;;  %p4668_p1 = scmp.lt.u32.totalorder %s4664_s15, %s5985_s1 }
   0xa   :  { %p4670_p2 = pnand %p4668_p1, %p4665_p0 }
   0xc   :  { %4673 = shalt.err (!%p4670_p2)
}
   0xd   :  { %s4674_s20 = scalar_lea.vmem %s38_s10, 4096  ;;  %p4679_p4 = scmp.lt.s32.totalorder %s38_s10, %s38_s10 }
   0xe   :  { %p4675_p3 = scmp.ne.s32.totalorder %s38_s10, %s4674_s20  ;;  %p4680_p5 = scmp.lt.s32.totalorder %s4674_s20, %s4674_s20 }
  0x10   :  { %p4681_p6 = por %p4680_p5, %p4679_p4 }
  0x12   :  { %p4682_p7 = pnand %p4681_p6, %p4675_p3 }
  0x14   :  { %4685 = shalt.err (!%p4682_p7)
}
  0x15   :  { %s4898_s21 = smov 128   ;;  %s4899_s22 = smov 8  }
  0x16   :  { %43 = dma.hbm_to_vmem [thread:$0]  %s5985_s1, 4096, %s38_s10, [#allocation6], %s4898_s21, %s4898_s21, %s4899_s22  }
  0x17   :  { %s4686_s27 = scalar_lea.hbm %s5987_s3, 4096 }
  0x18   :  { %p4687_p8 = scmp.ne.s32.totalorder %s5987_s3, %s4686_s27  ;;  %p4690_p9 = scmp.lt.u32.totalorder %s4686_s27, %s5987_s3 }
  0x1a   :  { %p4692_p10 = pnand %p4690_p9, %p4687_p8 }
  0x1c   :  { %4695 = shalt.err (!%p4692_p10)
}
  0x1d   :  { %s4696_s13 = scalar_lea.vmem %s4965_s12, 4096  ;;  %p4701_p12 = scmp.lt.s32.totalorder %s4965_s12, %s4965_s12 }
  0x1e   :  { %p4697_p11 = scmp.ne.s32.totalorder %s4965_s12, %s4696_s13  ;;  %p4702_p13 = scmp.lt.s32.totalorder %s4696_s13, %s4696_s13 }
  0x20   :  { %p4703_p0 = por %p4702_p13, %p4701_p12 }
  0x22   :  { %p4704_p1 = pnand %p4703_p0, %p4697_p11 }
  0x24   :  { %4707 = shalt.err (!%p4704_p1)
}
  0x25   :  { %s4900_s1 = smov 256   ;;  %s4901_s10 = smov 16  }
  0x26   :  { %67 = dma.hbm_to_vmem [thread:$0]  %s5987_s3, 4096, %s4965_s12, [#allocation9], %s4900_s1, %s4900_s1, %s4901_s10  }
  0x27   :  { %s4902_s16 = smov [#allocation11]   ;;  %s4903_s18 = smov [#allocation14]  }
  0x28   :  { %s85_s17 = sshll.u32 %s4902_s16, 4  ;;  %s109_s19 = sshll.u32 %s4903_s18, 4  ;;  %s86_s17 = int_to_ptr.vmem [resolvable:$true] %s85_s17  ;;  %s4999_s19 = int_to_ptr.vmem [resolvable:$true] %s109_s19 }
  0x29   :  { %s4708_s24 = scalar_lea.hbm %s5989_s5, 256 }
  0x2a   :  { %p4709_p2 = scmp.ne.s32.totalorder %s5989_s5, %s4708_s24  ;;  %p4712_p3 = scmp.lt.u32.totalorder %s4708_s24, %s5989_s5 }
  0x2c   :  { %p4714_p4 = pnand %p4712_p3, %p4709_p2 }
  0x2e   :  { %4717 = shalt.err (!%p4714_p4)
}
  0x2f   :  { %s4718_s3 = scalar_lea.vmem %s86_s17, 256  ;;  %p4723_p6 = scmp.lt.s32.totalorder %s86_s17, %s86_s17 }
  0x30   :  { %p4719_p5 = scmp.ne.s32.totalorder %s86_s17, %s4718_s3  ;;  %p4724_p7 = scmp.lt.s32.totalorder %s4718_s3, %s4718_s3 }
  0x32   :  { %p4725_p8 = por %p4724_p7, %p4723_p6 }
  0x34   :  { %p4726_p9 = pnand %p4725_p8, %p4719_p5 }
  0x36   :  { %4729 = shalt.err (!%p4726_p9)
}
  0x37   :  { %91 = dma.hbm_to_vmem [thread:$0]  %s5989_s5, 256, %s86_s17, [#allocation12], %s4898_s21, %s4898_s21, %s4899_s22  }
  0x38   :  { %s4730_s13 = scalar_lea.hbm %s5991_s7, 4096 }
  0x39   :  { %p4731_p10 = scmp.ne.s32.totalorder %s5991_s7, %s4730_s13  ;;  %p4734_p11 = scmp.lt.u32.totalorder %s4730_s13, %s5991_s7 }
  0x3b   :  { %p4736_p12 = pnand %p4734_p11, %p4731_p10 }
  0x3d   :  { %4739 = shalt.err (!%p4736_p12)
}
  0x3e   :  { %s4740_s16 = scalar_lea.vmem %s4999_s19, 4096  ;;  %p4745_p0 = scmp.lt.s32.totalorder %s4999_s19, %s4999_s19 }
  0x3f   :  { %p4741_p13 = scmp.ne.s32.totalorder %s4999_s19, %s4740_s16  ;;  %p4746_p1 = scmp.lt.s32.totalorder %s4740_s16, %s4740_s16 }
  0x41   :  { %p4747_p2 = por %p4746_p1, %p4745_p0 }
  0x43   :  { %p4748_p3 = pnand %p4747_p2, %p4741_p13 }
  0x45   :  { %4751 = shalt.err (!%p4748_p3)
}
  0x46   :  { %115 = dma.hbm_to_vmem [thread:$0]  %s5991_s7, 4096, %s4999_s19, [#allocation15], %s4898_s21, %s4898_s21, %s4899_s22  }
  0x47   :  { %s4904_s18 = smov [#allocation2]   ;;  %s4905_s23 = smov [#allocation7]  }
  0x48   :  { %s25_s20 = sshll.u32 %s4904_s18, 4  ;;  %s49_s24 = sshll.u32 %s4905_s23, 4  ;;  %s26_s20 = int_to_ptr.vmem [resolvable:$true] %s25_s20  ;;  %s5036_s24 = int_to_ptr.vmem [resolvable:$true] %s49_s24 }
  0x49   :  { %s4752_s27 = scalar_lea.hbm %s5984_s0, 256 }
  0x4a   :  { %p4753_p4 = scmp.ne.s32.totalorder %s5984_s0, %s4752_s27  ;;  %p4756_p5 = scmp.lt.u32.totalorder %s4752_s27, %s5984_s0 }
  0x4c   :  { %p4758_p6 = pnand %p4756_p5, %p4753_p4 }
  0x4e   :  { %4761 = shalt.err (!%p4758_p6)
}
  0x4f   :  { %s4762_s7 = scalar_lea.vmem %s26_s20, 256  ;;  %p4767_p8 = scmp.lt.s32.totalorder %s26_s20, %s26_s20 }
  0x50   :  { %p4763_p7 = scmp.ne.s32.totalorder %s26_s20, %s4762_s7  ;;  %p4768_p9 = scmp.lt.s32.totalorder %s4762_s7, %s4762_s7 }
  0x52   :  { %p4769_p10 = por %p4768_p9, %p4767_p8 }
  0x54   :  { %p4770_p11 = pnand %p4769_p10, %p4763_p7 }
  0x56   :  { %4773 = shalt.err (!%p4770_p11)
}
  0x57   :  { %31 = dma.hbm_to_vmem [thread:$0]  %s5984_s0, 256, %s26_s20, [#allocation3], %s4898_s21, %s4898_s21, %s4899_s22  }
  0x58   :  { %s4774_s1 = scalar_lea.hbm %s5986_s2, 2048 }
  0x59   :  { %p4775_p12 = scmp.ne.s32.totalorder %s5986_s2, %s4774_s1  ;;  %p4778_p13 = scmp.lt.u32.totalorder %s4774_s1, %s5986_s2 }
  0x5b   :  { %p4780_p0 = pnand %p4778_p13, %p4775_p12 }
  0x5d   :  { %4783 = shalt.err (!%p4780_p0)
}
  0x5e   :  { %s4784_s5 = scalar_lea.vmem %s5036_s24, 2048  ;;  %p4789_p2 = scmp.lt.s32.totalorder %s5036_s24, %s5036_s24 }
  0x5f   :  { %p4785_p1 = scmp.ne.s32.totalorder %s5036_s24, %s4784_s5  ;;  %p4790_p3 = scmp.lt.s32.totalorder %s4784_s5, %s4784_s5 }
  0x61   :  { %p4791_p4 = por %p4790_p3, %p4789_p2 }
  0x63   :  { %p4792_p5 = pnand %p4791_p4, %p4785_p1 }
  0x65   :  { %4795 = shalt.err (!%p4792_p5)
}
  0x66   :  { %55 = dma.hbm_to_vmem [thread:$0]  %s5986_s2, 2048, %s5036_s24, [#allocation6], %s4898_s21, %s4898_s21, %s4899_s22  }
  0x67   :  { %s4906_s18 = smov [#allocation10]   ;;  %s4907_s23 = smov [#allocation13]  }
  0x68   :  { %s73_s20 = sshll.u32 %s4906_s18, 4  ;;  %s97_s25 = sshll.u32 %s4907_s23, 4  ;;  %s74_s20 = int_to_ptr.vmem [resolvable:$true] %s73_s20  ;;  %s5073_s25 = int_to_ptr.vmem [resolvable:$true] %s97_s25 }
  0x69   :  { %s4796_s28 = scalar_lea.hbm %s5988_s4, 256 }
  0x6a   :  { %p4797_p6 = scmp.ne.s32.totalorder %s5988_s4, %s4796_s28  ;;  %p4800_p7 = scmp.lt.u32.totalorder %s4796_s28, %s5988_s4 }
  0x6c   :  { %p4802_p8 = pnand %p4800_p7, %p4797_p6 }
  0x6e   :  { %4805 = shalt.err (!%p4802_p8)
}
  0x6f   :  { %s4806_s2 = scalar_lea.vmem %s74_s20, 256  ;;  %p4811_p10 = scmp.lt.s32.totalorder %s74_s20, %s74_s20 }
  0x70   :  { %p4807_p9 = scmp.ne.s32.totalorder %s74_s20, %s4806_s2  ;;  %p4812_p11 = scmp.lt.s32.totalorder %s4806_s2, %s4806_s2 }
  0x72   :  { %p4813_p12 = por %p4812_p11, %p4811_p10 }
  0x74   :  { %p4814_p13 = pnand %p4813_p12, %p4807_p9 }
  0x76   :  { %4817 = shalt.err (!%p4814_p13)
}
  0x77   :  { %79 = dma.hbm_to_vmem [thread:$0]  %s5988_s4, 256, %s74_s20, [#allocation9], %s4898_s21, %s4898_s21, %s4899_s22  }
  0x78   :  { %s4818_s13 = scalar_lea.hbm %s5990_s6, 4096 }
  0x79   :  { %p4819_p0 = scmp.ne.s32.totalorder %s5990_s6, %s4818_s13  ;;  %p4822_p1 = scmp.lt.u32.totalorder %s4818_s13, %s5990_s6 }
  0x7b   :  { %p4824_p2 = pnand %p4822_p1, %p4819_p0 }
  0x7d   :  { %4827 = shalt.err (!%p4824_p2)
}
  0x7e   :  { %s4828_s16 = scalar_lea.vmem %s5073_s25, 4096  ;;  %p4833_p4 = scmp.lt.s32.totalorder %s5073_s25, %s5073_s25 }
  0x7f   :  { %p4829_p3 = scmp.ne.s32.totalorder %s5073_s25, %s4828_s16  ;;  %p4834_p5 = scmp.lt.s32.totalorder %s4828_s16, %s4828_s16 }
  0x81   :  { %p4835_p6 = por %p4834_p5, %p4833_p4 }
  0x83   :  { %p4836_p7 = pnand %p4835_p6, %p4829_p3 }
  0x85   :  { %4839 = shalt.err (!%p4836_p7)
}
  0x86   :  { %103 = dma.hbm_to_vmem [thread:$0]  %s5990_s6, 4096, %s5073_s25, [#allocation12], %s4898_s21, %s4898_s21, %s4899_s22  }
  0x87   :  { %s4908_s0 = smov [#allocation16]   ;;  %s4840_s23 = scalar_lea.hbm %s5992_s8, 2048 }
  0x88   :  { %s121_s17 = sshll.u32 %s4908_s0, 4  ;;  %p4841_p8 = scmp.ne.s32.totalorder %s5992_s8, %s4840_s23  ;;  %s122_s17 = int_to_ptr.vmem [resolvable:$true] %s121_s17 }
  0x89   :  { %p4844_p9 = scmp.lt.u32.totalorder %s4840_s23, %s5992_s8 }
  0x8b   :  { %p4846_p10 = pnand %p4844_p9, %p4841_p8 }
  0x8d   :  { %4849 = shalt.err (!%p4846_p10)
}
  0x8e   :  { %s4850_s12 = scalar_lea.vmem %s122_s17, 2048  ;;  %p4855_p12 = scmp.lt.s32.totalorder %s122_s17, %s122_s17 }
  0x8f   :  { %p4851_p11 = scmp.ne.s32.totalorder %s122_s17, %s4850_s12  ;;  %p4856_p13 = scmp.lt.s32.totalorder %s4850_s12, %s4850_s12 }
  0x91   :  { %p4857_p0 = por %p4856_p13, %p4855_p12 }
  0x93   :  { %p4858_p1 = pnand %p4857_p0, %p4851_p11 }
  0x95   :  { %4861 = shalt.err (!%p4858_p1)
}
  0x96   :  { %127 = dma.hbm_to_vmem [thread:$0]  %s5992_s8, 2048, %s122_s17, [#allocation15], %s4898_s21, %s4898_s21, %s4899_s22  }
  0x97   :  { %4884 = dma.done.wait [#allocation3], 256  }
  0x98   :  { %4885 = vsyncadd [#allocation3], 4294967040 }
  0x99   :  { %4886 = dma.done.wait [#allocation6], 6144  }
  0x9a   :  { %4887 = vsyncadd [#allocation6], 4294961152 }
  0x9b   :  { %4888 = dma.done.wait [#allocation9], 4352  }
  0x9c   :  { %4889 = vsyncadd [#allocation9], 4294962944 }
  0x9d   :  { %4890 = dma.done.wait [#allocation12], 4352  }
  0x9e   :  { %4891 = vsyncadd [#allocation12], 4294962944 }
  0x9f   :  { %4892 = dma.done.wait [#allocation15], 6144  }
  0xa0   :  { %4893 = vsyncadd [#allocation15], 4294961152  ;;  %v5996_v0 = vmov 0.0   ;;  %v190_v1 = vld [vmem:[#allocation8 + $0x8] sm:$0xff]  ;;  %v192_v2 = vld [vmem:[#allocation8 + $0x18] sm:$0xff]  ;;  %s4911_s8 = smov 64  }
  0xa1   :  { %285 = vmatprep.mubr.f32.mxu0 %v5996_v0  ;;  %v991_v3 = vld [vmem:[#allocation7] sm:$0xff]  ;;  %v4321_v4 = vpack.c.bf16 %v192_v2, %v190_v1  ;;  %v992_v5 = vld [vmem:[#allocation7 + $0x8] sm:$0xff]  ;;  %v191_v7 = vld [vmem:[#allocation8 + $0x10] sm:$0xff]  ;;  %vm4912_vm0 = vmmov 0   ;;  %vm2366_vm1 = vcmask 122880   ;;  %vm2543_vm2 = vcmask 130048  }
  0xa2   :  { %v189_v6 = vld [vmem:[#allocation8] sm:$0xff]  ;;  %v4353_v8 = vpack.c.bf16 %v992_v5, %v991_v3  ;;  %v194_v10 = vld [vmem:[#allocation8 + $0x28] sm:$0xff]  ;;  %v196_v11 = vld [vmem:[#allocation8 + $0x38] sm:$0xff]  ;;  %vm3745_vm3 = vcmask 1041409   ;;  %vm3748_vm4 = vcmask 1042434   ;;  %vm3751_vm5 = vcmask 1043459  }
  0xa3   :  { %v4323_v9 = vpack.c.bf16 %v191_v7, %v189_v6  ;;  %v993_v12 = vld [vmem:[#allocation7 + $0x10] sm:$0xff]  ;;  %4322 = vmatprep.subr.bf16.mxu0 %v4321_v4  ;;  %v4325_v13 = vpack.c.bf16 %v196_v11, %v194_v10  ;;  %v994_v14 = vld [vmem:[#allocation7 + $0x18] sm:$0xff]  ;;  %v193_v15 = vld [vmem:[#allocation8 + $0x20] sm:$0xff]  ;;  %vm3754_vm6 = vcmask 1044484   ;;  %vm3757_vm7 = vcmask 1045509   ;;  %s4914_s29 = smov [#allocation17]  }
  0xa4   :  { %v195_v16 = vld [vmem:[#allocation8 + $0x30] sm:$0xff]  ;;  %4354 = vmatprep.subr.bf16.mxu1 %v4353_v8  ;;  %v4357_v17 = vpack.c.bf16 %v994_v14, %v993_v12  ;;  %v198_v19 = vld [vmem:[#allocation8 + $0x48] sm:$0xff]  ;;  %v200_v20 = vld [vmem:[#allocation8 + $0x58] sm:$0xff]  ;;  %vm3760_vm8 = vcmask 1046534   ;;  %vm3763_vm9 = vcmask 1047559   ;;  %s3863_s7 = sshll.u32 %s4914_s29, 4  ;;  %s3864_s7 = int_to_ptr.vmem [resolvable:$true] %s3863_s7 }
  0xa5   :  { %4324 = vmatpush1.bf16.msra.mxu0 %v4323_v9  ;;  %v4327_v18 = vpack.c.bf16 %v195_v16, %v193_v15  ;;  %v995_v21 = vld [vmem:[#allocation7 + $0x20] sm:$0xff]  ;;  %4356 = vmatpush3.bf16.msra.mxu1 %v4353_v8  ;;  %v4329_v22 = vpack.c.bf16 %v200_v20, %v198_v19  ;;  %v996_v23 = vld [vmem:[#allocation7 + $0x28] sm:$0xff]  ;;  %v199_v25 = vld [vmem:[#allocation8 + $0x50] sm:$0xff]  ;;  %s4862_s2 = scalar_lea.vmem %s3864_s7, 256  ;;  %p4867_p3 = scmp.lt.s32.totalorder %s3864_s7, %s3864_s7 }
  0xa6   :  { %4326 = vmatprep.subr.bf16.mxu0 %v4325_v13  ;;  %v197_v24 = vld [vmem:[#allocation8 + $0x40] sm:$0xff]  ;;  %4358 = vmatprep.subr.bf16.mxu1 %v4357_v17  ;;  %v4361_v26 = vpack.c.bf16 %v996_v23, %v995_v21  ;;  %v202_v27 = vld [vmem:[#allocation8 + $0x68] sm:$0xff]  ;;  %v204_v28 = vld [vmem:[#allocation8 + $0x78] sm:$0xff]  ;;  %p4863_p2 = scmp.ne.s32.totalorder %s3864_s7, %s4862_s2  ;;  %p4868_p4 = scmp.lt.s32.totalorder %s4862_s2, %s4862_s2 }
  0xa7   :  { %v997_v29 = vld [vmem:[#allocation7 + $0x30] sm:$0xff]  ;;  %v998_v30 = vld [vmem:[#allocation7 + $0x38] sm:$0xff]  ;;  %v4331_v31 = vpack.c.bf16 %v199_v25, %v197_v24  ;;  %v4333_v32 = vpack.c.bf16 %v204_v28, %v202_v27  ;;  %v201_v33 = vld [vmem:[#allocation8 + $0x60] sm:$0xff] }
  0xa8   :  { %v203_v34 = vld [vmem:[#allocation8 + $0x70] sm:$0xff]  ;;  %v4365_v35 = vpack.c.bf16 %v998_v30, %v997_v29  ;;  %v206_v36 = vld [vmem:[#allocation8 + $0x88] sm:$0xff]  ;;  %v208_v37 = vld [vmem:[#allocation8 + $0x98] sm:$0xff]  ;;  %p4869_p5 = por %p4868_p4, %p4867_p3 }
  0xa9   :  { %4328 = vmatpush1.bf16.msra.mxu0 %v4327_v18  ;;  %4360 = vmatpush3.bf16.msra.mxu1 %v4357_v17  ;;  %v999_v38 = vld [vmem:[#allocation7 + $0x40] sm:$0xff]  ;;  %v1000_v39 = vld [vmem:[#allocation7 + $0x48] sm:$0xff]  ;;  %v4335_v40 = vpack.c.bf16 %v203_v34, %v201_v33  ;;  %v4337_v41 = vpack.c.bf16 %v208_v37, %v206_v36  ;;  %v207_v43 = vld [vmem:[#allocation8 + $0x90] sm:$0xff] }
  0xaa   :  { %4330 = vmatprep.subr.bf16.mxu0 %v4329_v22  ;;  %4362 = vmatprep.subr.bf16.mxu1 %v4361_v26  ;;  %v205_v42 = vld [vmem:[#allocation8 + $0x80] sm:$0xff]  ;;  %v4369_v44 = vpack.c.bf16 %v1000_v39, %v999_v38  ;;  %v210_v45 = vld [vmem:[#allocation8 + $0xa8] sm:$0xff]  ;;  %v212_v46 = vld [vmem:[#allocation8 + $0xb8] sm:$0xff]  ;;  %p4870_p6 = pnand %p4869_p5, %p4863_p2 }
  0xab   :  { %v1001_v47 = vld [vmem:[#allocation7 + $0x50] sm:$0xff]  ;;  %v1002_v48 = vld [vmem:[#allocation7 + $0x58] sm:$0xff]  ;;  %v4339_v49 = vpack.c.bf16 %v207_v43, %v205_v42  ;;  %v4341_v51 = vpack.c.bf16 %v212_v46, %v210_v45  ;;  %v209_v52 = vld [vmem:[#allocation8 + $0xa0] sm:$0xff] }
  0xac   :  { %v155_v50 = vld [vmem:[#allocation2] sm:$0xff]  ;;  %v4373_v54 = vpack.c.bf16 %v1002_v48, %v1001_v47  ;;  %v214_v55 = vld [vmem:[#allocation8 + $0xc8] sm:$0xff]  ;;  %v216_v56 = vld [vmem:[#allocation8 + $0xd8] sm:$0xff] }
  0xad   :  { %4332 = vmatpush1.bf16.msra.mxu0 %v4331_v31  ;;  %4364 = vmatpush3.bf16.msra.mxu1 %v4361_v26  ;;  %v211_v53 = vld [vmem:[#allocation8 + $0xb0] sm:$0xff]  ;;  %v1003_v57 = vld [vmem:[#allocation7 + $0x60] sm:$0xff]  ;;  %v1004_v58 = vld [vmem:[#allocation7 + $0x68] sm:$0xff]  ;;  %v4345_v60 = vpack.c.bf16 %v216_v56, %v214_v55 }
  0xae   :  { %4334 = vmatprep.subr.bf16.mxu0 %v4333_v32  ;;  %4366 = vmatprep.subr.bf16.mxu1 %v4365_v35  ;;  %v4343_v59 = vpack.c.bf16 %v211_v53, %v209_v52  ;;  %v213_v61 = vld [vmem:[#allocation8 + $0xc0] sm:$0xff]  ;;  %v215_v62 = vld [vmem:[#allocation8 + $0xd0] sm:$0xff]  ;;  %v4377_v63 = vpack.c.bf16 %v1004_v58, %v1003_v57  ;;  %v218_v1 = vld [vmem:[#allocation8 + $0xe8] sm:$0xff] }
  0xaf   :  { %4059 = vmatprep.mubr.f32.mxu1 %v155_v50  ;;  %v220_v2 = vld [vmem:[#allocation8 + $0xf8] sm:$0xff]  ;;  %v1005_v3 = vld [vmem:[#allocation7 + $0x70] sm:$0xff]  ;;  %v4347_v5 = vpack.c.bf16 %v215_v62, %v213_v61  ;;  %v217_v7 = vld [vmem:[#allocation8 + $0xe0] sm:$0xff] }
  0xb0   :  { %v1006_v4 = vld [vmem:[#allocation7 + $0x78] sm:$0xff]  ;;  %v4349_v6 = vpack.c.bf16 %v220_v2, %v218_v1  ;;  %v219_v8 = vld [vmem:[#allocation8 + $0xf0] sm:$0xff]  ;;  %v157_v11 = vld [vmem:[#allocation5] sm:$0xff] }
  0xb1   :  { %4336 = vmatpush1.bf16.msra.mxu0 %v4335_v40  ;;  %4368 = vmatpush3.bf16.msra.mxu1 %v4365_v35  ;;  %v4381_v9 = vpack.c.bf16 %v1006_v4, %v1005_v3  ;;  %v4351_v10 = vpack.c.bf16 %v219_v8, %v217_v7  ;;  %v156_v12 = vld [vmem:[#allocation2 + $0x8] sm:$0xff]  ;;  %v158_v13 = vld [vmem:[#allocation5 + $0x8] sm:$0xff]  ;;  %v159_v14 = vld [vmem:[#allocation5 + $0x10] sm:$0xff] }
  0xb2   :  { %4338 = vmatprep.subr.bf16.mxu0 %v4337_v41  ;;  %4370 = vmatprep.subr.bf16.mxu1 %v4369_v44  ;;  %v160_v15 = vld [vmem:[#allocation5 + $0x18] sm:$0xff]  ;;  %v161_v16 = vld [vmem:[#allocation5 + $0x20] sm:$0xff]  ;;  %v162_v17 = vld [vmem:[#allocation5 + $0x28] sm:$0xff] }
  0xb3   :  { %v163_v18 = vld [vmem:[#allocation5 + $0x30] sm:$0xff]  ;;  %v164_v19 = vld [vmem:[#allocation5 + $0x38] sm:$0xff]  ;;  %v165_v20 = vld [vmem:[#allocation5 + $0x40] sm:$0xff] }
  0xb4   :  { %v166_v21 = vld [vmem:[#allocation5 + $0x48] sm:$0xff]  ;;  %v167_v22 = vld [vmem:[#allocation5 + $0x50] sm:$0xff]  ;;  %v168_v23 = vld [vmem:[#allocation5 + $0x58] sm:$0xff] }
  0xb5   :  { %4340 = vmatpush1.bf16.msra.mxu0 %v4339_v49  ;;  %4372 = vmatpush3.bf16.msra.mxu1 %v4369_v44  ;;  %v169_v24 = vld [vmem:[#allocation5 + $0x60] sm:$0xff]  ;;  %v170_v25 = vld [vmem:[#allocation5 + $0x68] sm:$0xff]  ;;  %v171_v26 = vld [vmem:[#allocation5 + $0x70] sm:$0xff]  ;;  %v5994_v44 = vmov 0.0|0.0  }
  0xb6   :  { %4342 = vmatprep.subr.bf16.mxu0 %v4341_v51  ;;  %4374 = vmatprep.subr.bf16.mxu1 %v4373_v54  ;;  %v172_v27 = vld [vmem:[#allocation5 + $0x78] sm:$0xff]  ;;  %v173_v28 = vld [vmem:[#allocation5 + $0x80] sm:$0xff]  ;;  %v174_v29 = vld [vmem:[#allocation5 + $0x88] sm:$0xff] }
  0xb7   :  { %v175_v30 = vld [vmem:[#allocation5 + $0x90] sm:$0xff]  ;;  %v176_v31 = vld [vmem:[#allocation5 + $0x98] sm:$0xff]  ;;  %v177_v32 = vld [vmem:[#allocation5 + $0xa0] sm:$0xff] }
  0xb8   :  { %v178_v33 = vld [vmem:[#allocation5 + $0xa8] sm:$0xff]  ;;  %v179_v34 = vld [vmem:[#allocation5 + $0xb0] sm:$0xff]  ;;  %v180_v35 = vld [vmem:[#allocation5 + $0xb8] sm:$0xff] }
  0xb9   :  { %4344 = vmatpush1.bf16.msra.mxu0 %v4343_v59  ;;  %4376 = vmatpush3.bf16.msra.mxu1 %v4373_v54  ;;  %v181_v36 = vld [vmem:[#allocation5 + $0xc0] sm:$0xff]  ;;  %v182_v37 = vld [vmem:[#allocation5 + $0xc8] sm:$0xff]  ;;  %v183_v38 = vld [vmem:[#allocation5 + $0xd0] sm:$0xff] }
  0xba   :  { %4346 = vmatprep.subr.bf16.mxu0 %v4345_v60  ;;  %4378 = vmatprep.subr.bf16.mxu1 %v4377_v63  ;;  %v184_v39 = vld [vmem:[#allocation5 + $0xd8] sm:$0xff]  ;;  %v185_v40 = vld [vmem:[#allocation5 + $0xe0] sm:$0xff]  ;;  %v186_v41 = vld [vmem:[#allocation5 + $0xe8] sm:$0xff] }
  0xbb   :  { %v187_v42 = vld [vmem:[#allocation5 + $0xf0] sm:$0xff]  ;;  %v188_v43 = vld [vmem:[#allocation5 + $0xf8] sm:$0xff] }
  0xbd   :  { %4348 = vmatpush1.bf16.msra.mxu0 %v4347_v5  ;;  %4380 = vmatpush3.bf16.msra.mxu1 %v4377_v63 }
  0xbe   :  { %4350 = vmatprep.subr.bf16.mxu0 %v4349_v6  ;;  %4382 = vmatprep.subr.bf16.mxu1 %v4381_v9 }
  0xc1   :  { %4352 = vmatpush1.bf16.msra.mxu0 %v4351_v10  ;;  %4384 = vmatpush3.bf16.msra.mxu1 %v4381_v9 }
  0xc2   :  { %4451 = vmatprep.subr.bf16.mxu0 %v5994_v44  ;;  %4385 = vmatprep.subr.bf16.mxu1 %v5994_v44 }
  0xc4   :  { %286 = vmatmul.mubr.f32.vlgmr.msra.gmra.mrb[0].mxu0 %v157_v11  ;;  %4060 = vmatmul.mubr.f32.vlgmr.msra.gmra.mrb[0].mxu1 %v156_v12 }
  0xc5   :  { %291 = vmatprep.mubr.f32.mxu0 %v5996_v0 }
  0xc8   :  { %292 = vmatmul.mubr.f32.gmra.mrb[2].mxu0 %v158_v13 }
  0xc9   :  { %297 = vmatprep.mubr.f32.mxu0 %v5996_v0 }
  0xcc   :  { %298 = vmatmul.mubr.f32.gmra.mrb[4].mxu0 %v159_v14 }
  0xcd   :  { %303 = vmatprep.mubr.f32.mxu0 %v5996_v0 }
  0xd0   :  { %304 = vmatmul.mubr.f32.gmra.mrb[6].mxu0 %v160_v15 }
  0xd1   :  { %309 = vmatprep.mubr.f32.mxu0 %v5996_v0 }
  0xd4   :  { %310 = vmatmul.mubr.f32.gmra.mrb[8].mxu0 %v161_v16 }
  0xd5   :  { %315 = vmatprep.mubr.f32.mxu0 %v5996_v0 }
  0xd8   :  { %316 = vmatmul.mubr.f32.gmra.mrb[10].mxu0 %v162_v17 }
  0xd9   :  { %321 = vmatprep.mubr.f32.mxu0 %v5996_v0 }
  0xdc   :  { %322 = vmatmul.mubr.f32.gmra.mrb[12].mxu0 %v163_v18 }
  0xdd   :  { %327 = vmatprep.mubr.f32.mxu0 %v5996_v0 }
  0xe0   :  { %328 = vmatmul.mubr.f32.gmra.mrb[14].mxu0 %v164_v19 }
  0xe1   :  { %333 = vmatprep.mubr.f32.mxu0 %v5996_v0 }
  0xe4   :  { %334 = vmatmul.mubr.f32.gmra.mrb[16].mxu0 %v165_v20 }
  0xe5   :  { %339 = vmatprep.mubr.f32.mxu0 %v5996_v0 }
  0xe8   :  { %340 = vmatmul.mubr.f32.gmra.mrb[18].mxu0 %v166_v21 }
  0xe9   :  { %345 = vmatprep.mubr.f32.mxu0 %v5996_v0 }
  0xec   :  { %346 = vmatmul.mubr.f32.gmra.mrb[20].mxu0 %v167_v22 }
  0xed   :  { %351 = vmatprep.mubr.f32.mxu0 %v5996_v0 }
  0xf0   :  { %352 = vmatmul.mubr.f32.gmra.mrb[22].mxu0 %v168_v23 }
  0xf1   :  { %357 = vmatprep.mubr.f32.mxu0 %v5996_v0 }
  0xf4   :  { %358 = vmatmul.mubr.f32.gmra.mrb[24].mxu0 %v169_v24 }
  0xf5   :  { %363 = vmatprep.mubr.f32.mxu0 %v5996_v0 }
  0xf8   :  { %364 = vmatmul.mubr.f32.gmra.mrb[26].mxu0 %v170_v25 }
  0xf9   :  { %369 = vmatprep.mubr.f32.mxu0 %v5996_v0 }
  0xfc   :  { %370 = vmatmul.mubr.f32.gmra.mrb[28].mxu0 %v171_v26 }
  0xfd   :  { %375 = vmatprep.mubr.f32.mxu0 %v5996_v0 }
 0x100   :  { %376 = vmatmul.mubr.f32.gmra.mrb[30].mxu0 %v172_v27 }
 0x101   :  { %381 = vmatprep.mubr.f32.mxu0 %v5996_v0 }
 0x104   :  { %382 = vmatmul.mubr.f32.gmra.mrb[32].mxu0 %v173_v28 }
 0x105   :  { %387 = vmatprep.mubr.f32.mxu0 %v5996_v0 }
 0x108   :  { %388 = vmatmul.mubr.f32.gmra.mrb[34].mxu0 %v174_v29 }
 0x109   :  { %393 = vmatprep.mubr.f32.mxu0 %v5996_v0 }
 0x10c   :  { %394 = vmatmul.mubr.f32.gmra.mrb[36].mxu0 %v175_v30 }
 0x10d   :  { %399 = vmatprep.mubr.f32.mxu0 %v5996_v0 }
 0x110   :  { %400 = vmatmul.mubr.f32.gmra.mrb[38].mxu0 %v176_v31 }
 0x111   :  { %405 = vmatprep.mubr.f32.mxu0 %v5996_v0 }
 0x114   :  { %406 = vmatmul.mubr.f32.gmra.mrb[40].mxu0 %v177_v32 }
 0x115   :  { %411 = vmatprep.mubr.f32.mxu0 %v5996_v0 }
 0x118   :  { %412 = vmatmul.mubr.f32.gmra.mrb[42].mxu0 %v178_v33 }
 0x119   :  { %417 = vmatprep.mubr.f32.mxu0 %v5996_v0 }
 0x11c   :  { %418 = vmatmul.mubr.f32.gmra.mrb[44].mxu0 %v179_v34 }
 0x11d   :  { %423 = vmatprep.mubr.f32.mxu0 %v5996_v0 }
 0x120   :  { %424 = vmatmul.mubr.f32.gmra.mrb[46].mxu0 %v180_v35 }
 0x121   :  { %429 = vmatprep.mubr.f32.mxu0 %v5996_v0 }
 0x124   :  { %430 = vmatmul.mubr.f32.gmra.mrb[48].mxu0 %v181_v36 }
 0x125   :  { %435 = vmatprep.mubr.f32.mxu0 %v5996_v0 }
 0x128   :  { %436 = vmatmul.mubr.f32.gmra.mrb[50].mxu0 %v182_v37 }
 0x129   :  { %441 = vmatprep.mubr.f32.mxu0 %v5996_v0 }
 0x12c   :  { %442 = vmatmul.mubr.f32.gmra.mrb[52].mxu0 %v183_v38 }
 0x12d   :  { %447 = vmatprep.mubr.f32.mxu0 %v5996_v0 }
 0x130   :  { %448 = vmatmul.mubr.f32.gmra.mrb[54].mxu0 %v184_v39 }
 0x131   :  { %453 = vmatprep.mubr.f32.mxu0 %v5996_v0 }
 0x134   :  { %454 = vmatmul.mubr.f32.gmra.mrb[56].mxu0 %v185_v40 }
 0x135   :  { %459 = vmatprep.mubr.f32.mxu0 %v5996_v0 }
 0x138   :  { %460 = vmatmul.mubr.f32.gmra.mrb[58].mxu0 %v186_v41 }
 0x139   :  { %465 = vmatprep.mubr.f32.mxu0 %v5996_v0 }
 0x13c   :  { %466 = vmatmul.mubr.f32.gmra.mrb[60].mxu0 %v187_v42 }
 0x13d   :  { %471 = vmatprep.mubr.f32.mxu0 %v5996_v0 }
 0x140   :  { %472 = vmatmul.mubr.f32.gmra.mrb[62].mxu0 %v188_v43 }
 0x197   :  { %v5159_v45 = vpop.f32.mrb[0].mxu0  ;;  %v5161_v46 = vpop.f32.mrb[0].mxu1 }
 0x198   :  { %v5163_v47 = vpop.f32.mrb[1].mxu0  ;;  %v478_v48 = vmul.f32 %v5159_v45, %v5159_v45  ;;  %v1083_v49 = vmul.f32 %v5161_v46, %v5161_v46  ;;  %v5169_v50 = vpop.f32.mrb[1].mxu1 }
 0x199   :  { %v1082_v52 = vmul.f32 %v5169_v50, %v5169_v50 }
 0x19a   :  { %510 = vadd.xlane.f32.xlu0 %v478_v48  ;;  %1086 = vadd.xlane.f32.xlu1 %v1083_v49 }
 0x19b   :  { %v5171_v51 = vpop.f32.mrb[2].mxu0 }
 0x19c   :  { %v5175_v53 = vpop.f32.mrb[3].mxu0  ;;  %v479_v54 = vmul.f32 %v5171_v51, %v5171_v51 }
 0x19e   :  { %512 = vadd.xlane.f32.xlu0 %v479_v54  ;;  %1084 = vadd.xlane.f32.xlu1 %v1082_v52 }
 0x19f   :  { %v5181_v56 = vpop.f32.mrb[4].mxu0 }
 0x1a0   :  { %v5183_v57 = vpop.f32.mrb[5].mxu0  ;;  %v480_v58 = vmul.f32 %v5181_v56, %v5181_v56 }
 0x1a1   :  { %6025 = vst [vmem:[#allocation24_spill] sm:$0xff] %v5183_v57 }
 0x1a2   :  { %514 = vadd.xlane.f32.xlu1 %v480_v58 }
 0x1a3   :  { %v5187_v59 = vpop.f32.mrb[6].mxu0 }
 0x1a4   :  { %v5189_v60 = vpop.f32.mrb[7].mxu0  ;;  %v481_v61 = vmul.f32 %v5187_v59, %v5187_v59 }
 0x1a6   :  { %516 = vadd.xlane.f32.xlu0 %v481_v61 }
 0x1a7   :  { %v5195_v63 = vpop.f32.mrb[8].mxu0 }
 0x1a8   :  { %v5197_v1 = vpop.f32.mrb[9].mxu0  ;;  %v482_v2 = vmul.f32 %v5195_v63, %v5195_v63 }
 0x1a9   :  { %6026 = vst [vmem:[#allocation25_spill] sm:$0xff] %v5197_v1 }
 0x1aa   :  { %518 = vadd.xlane.f32.xlu1 %v482_v2 }
 0x1ab   :  { %v5201_v3 = vpop.f32.mrb[10].mxu0 }
 0x1ac   :  { %v5203_v4 = vpop.f32.mrb[11].mxu0  ;;  %v483_v5 = vmul.f32 %v5201_v3, %v5201_v3 }
 0x1ad   :  { %6027 = vst [vmem:[#allocation26_spill] sm:$0xff] %v5203_v4 }
 0x1ae   :  { %520 = vadd.xlane.f32.xlu0 %v483_v5 }
 0x1af   :  { %v5209_v7 = vpop.f32.mrb[12].mxu0 }
 0x1b0   :  { %v5211_v8 = vpop.f32.mrb[13].mxu0  ;;  %v484_v9 = vmul.f32 %v5209_v7, %v5209_v7 }
 0x1b1   :  { %6028 = vst [vmem:[#allocation27_spill] sm:$0xff] %v5211_v8 }
 0x1b2   :  { %522 = vadd.xlane.f32.xlu1 %v484_v9 }
 0x1b3   :  { %v5215_v10 = vpop.f32.mrb[14].mxu0 }
 0x1b4   :  { %v5217_v11 = vpop.f32.mrb[15].mxu0  ;;  %v485_v12 = vmul.f32 %v5215_v10, %v5215_v10 }
 0x1b5   :  { %6029 = vst [vmem:[#allocation28_spill] sm:$0xff] %v5217_v11 }
 0x1b6   :  { %524 = vadd.xlane.f32.xlu0 %v485_v12 }
 0x1b7   :  { %v5223_v14 = vpop.f32.mrb[16].mxu0 }
 0x1b8   :  { %v5225_v15 = vpop.f32.mrb[17].mxu0  ;;  %v486_v16 = vmul.f32 %v5223_v14, %v5223_v14 }
 0x1b9   :  { %6030 = vst [vmem:[#allocation29_spill] sm:$0xff] %v5225_v15 }
 0x1ba   :  { %526 = vadd.xlane.f32.xlu1 %v486_v16 }
 0x1bb   :  { %v5229_v17 = vpop.f32.mrb[18].mxu0 }
 0x1bc   :  { %v487_v18 = vmul.f32 %v5229_v17, %v5229_v17  ;;  %v5233_v19 = vpop.f32.mrb[19].mxu0 }
 0x1bd   :  { %6031 = vst [vmem:[#allocation30_spill] sm:$0xff] %v5233_v19 }
 0x1be   :  { %528 = vadd.xlane.f32.xlu0 %v487_v18 }
 0x1bf   :  { %v5237_v21 = vpop.f32.mrb[20].mxu0 }
 0x1c0   :  { %v5239_v22 = vpop.f32.mrb[21].mxu0  ;;  %v488_v23 = vmul.f32 %v5237_v21, %v5237_v21 }
 0x1c1   :  { %6032 = vst [vmem:[#allocation31_spill] sm:$0xff] %v5239_v22 }
 0x1c2   :  { %530 = vadd.xlane.f32.xlu1 %v488_v23 }
 0x1c3   :  { %v5243_v24 = vpop.f32.mrb[22].mxu0 }
 0x1c4   :  { %v489_v25 = vmul.f32 %v5243_v24, %v5243_v24  ;;  %v5247_v26 = vpop.f32.mrb[23].mxu0 }
 0x1c5   :  { %6033 = vst [vmem:[#allocation32_spill] sm:$0xff] %v5247_v26 }
 0x1c6   :  { %532 = vadd.xlane.f32.xlu0 %v489_v25 }
 0x1c7   :  { %v5251_v28 = vpop.f32.mrb[24].mxu0 }
 0x1c8   :  { %v361_v29 = vpop.f32.mrb[25].mxu0  ;;  %v490_v30 = vmul.f32 %v5251_v28, %v5251_v28 }
 0x1ca   :  { %534 = vadd.xlane.f32.xlu1 %v490_v30 }
 0x1cb   :  { %v5255_v31 = vpop.f32.mrb[26].mxu0 }
 0x1cc   :  { %v491_v32 = vmul.f32 %v5255_v31, %v5255_v31  ;;  %v367_v33 = vpop.f32.mrb[27].mxu0 }
 0x1cd   :  { %v4452_v34 = vpack.c.bf16 %v367_v33, %v361_v29 }
 0x1ce   :  { %536 = vadd.xlane.f32.xlu0 %v491_v32 }
 0x1cf   :  { %v5259_v35 = vpop.f32.mrb[28].mxu0  ;;  %4453 = vmatpush3.bf16.msra.mxu0 %v4452_v34 }
 0x1d0   :  { %v5261_v36 = vpop.f32.mrb[29].mxu0  ;;  %v492_v37 = vmul.f32 %v5259_v35, %v5259_v35  ;;  %4457 = vmatprep.subr.bf16.mxu0 %v5994_v44 }
 0x1d1   :  { %6034 = vst [vmem:[#allocation33_spill] sm:$0xff] %v5261_v36 }
 0x1d2   :  { %538 = vadd.xlane.f32.xlu1 %v492_v37 }
 0x1d3   :  { %v5266_v38 = vpop.f32.mrb[30].mxu0 }
 0x1d4   :  { %v493_v39 = vmul.f32 %v5266_v38, %v5266_v38  ;;  %v5270_v40 = vpop.f32.mrb[31].mxu0 }
 0x1d5   :  { %6035 = vst [vmem:[#allocation34_spill] sm:$0xff] %v5270_v40 }
 0x1d6   :  { %540 = vadd.xlane.f32.xlu0 %v493_v39 }
 0x1d7   :  { %v5274_v42 = vpop.f32.mrb[32].mxu0 }
 0x1d8   :  { %v5276_v43 = vpop.f32.mrb[33].mxu0  ;;  %v494_v48 = vmul.f32 %v5274_v42, %v5274_v42 }
 0x1d9   :  { %6036 = vst [vmem:[#allocation35_spill] sm:$0xff] %v5276_v43 }
 0x1da   :  { %542 = vadd.xlane.f32.xlu1 %v494_v48 }
 0x1db   :  { %v5280_v49 = vpop.f32.mrb[34].mxu0 }
 0x1dc   :  { %v495_v52 = vmul.f32 %v5280_v49, %v5280_v49  ;;  %v5284_v54 = vpop.f32.mrb[35].mxu0 }
 0x1dd   :  { %6037 = vst [vmem:[#allocation36_spill] sm:$0xff] %v5284_v54 }
 0x1de   :  { %544 = vadd.xlane.f32.xlu0 %v495_v52 }
 0x1df   :  { %v5288_v61 = vpop.f32.mrb[36].mxu0 }
 0x1e0   :  { %v496_v2 = vmul.f32 %v5288_v61, %v5288_v61  ;;  %v5292_v5 = vpop.f32.mrb[37].mxu0 }
 0x1e1   :  { %6038 = vst [vmem:[#allocation37_spill] sm:$0xff] %v5292_v5 }
 0x1e2   :  { %546 = vadd.xlane.f32.xlu0 %v496_v2 }
 0x1e3   :  { %v5294_v9 = vpop.f32.mrb[38].mxu0 }
 0x1e4   :  { %v5296_v12 = vpop.f32.mrb[39].mxu0  ;;  %v497_v16 = vmul.f32 %v5294_v9, %v5294_v9 }
 0x1e5   :  { %6039 = vst [vmem:[#allocation38_spill] sm:$0xff] %v5296_v12 }
 0x1e6   :  { %548 = vadd.xlane.f32.xlu1 %v497_v16 }
 0x1e7   :  { %v5302_v23 = vpop.f32.mrb[40].mxu0 }
 0x1e8   :  { %v498_v25 = vmul.f32 %v5302_v23, %v5302_v23  ;;  %v5306_v29 = vpop.f32.mrb[41].mxu0 }
 0x1e9   :  { %6040 = vst [vmem:[#allocation39_spill] sm:$0xff] %v5306_v29 }
 0x1ea   :  { %550 = vadd.xlane.f32.xlu0 %v498_v25 }
 0x1eb   :  { %v5308_v30 = vpop.f32.mrb[42].mxu0 }
 0x1ec   :  { %v5310_v32 = vpop.f32.mrb[43].mxu0  ;;  %v499_v33 = vmul.f32 %v5308_v30, %v5308_v30 }
 0x1ed   :  { %6041 = vst [vmem:[#allocation40_spill] sm:$0xff] %v5310_v32 }
 0x1ee   :  { %552 = vadd.xlane.f32.xlu1 %v499_v33 }
 0x1ef   :  { %v5316_v37 = vpop.f32.mrb[44].mxu0 }
 0x1f0   :  { %v500_v39 = vmul.f32 %v5316_v37, %v5316_v37  ;;  %v5320_v48 = vpop.f32.mrb[45].mxu0 }
 0x1f1   :  { %6042 = vst [vmem:[#allocation41_spill] sm:$0xff] %v5320_v48 }
 0x1f2   :  { %554 = vadd.xlane.f32.xlu0 %v500_v39 }
 0x1f3   :  { %v5322_v52 = vpop.f32.mrb[46].mxu0 }
 0x1f4   :  { %v5324_v2 = vpop.f32.mrb[47].mxu0  ;;  %v501_v16 = vmul.f32 %v5322_v52, %v5322_v52 }
 0x1f5   :  { %6043 = vst [vmem:[#allocation42_spill] sm:$0xff] %v5324_v2 }
 0x1f6   :  { %556 = vadd.xlane.f32.xlu1 %v501_v16 }
 0x1f7   :  { %v5330_v33 = vpop.f32.mrb[48].mxu0 }
 0x1f8   :  { %v5332_v34 = vpop.f32.mrb[49].mxu0  ;;  %v502_v18 = vmul.f32 %v5330_v33, %v5330_v33 }
 0x1f9   :  { %6044 = vst [vmem:[#allocation43_spill] sm:$0xff] %v5332_v34 }
 0x1fa   :  { %558 = vadd.xlane.f32.xlu1 %v502_v18 }
 0x1fb   :  { %v5336_v39 = vpop.f32.mrb[50].mxu0 }
 0x1fc   :  { %v503_v58 = vmul.f32 %v5336_v39, %v5336_v39  ;;  %v5340_v41 = vpop.f32.mrb[51].mxu0 }
 0x1fd   :  { %6045 = vst [vmem:[#allocation44_spill] sm:$0xff] %v5340_v41 }
 0x1fe   :  { %560 = vadd.xlane.f32.xlu0 %v503_v58 }
 0x1ff   :  { %v5344_v16 = vpop.f32.mrb[52].mxu0 }
 0x200   :  { %v5346_v25 = vpop.f32.mrb[53].mxu0  ;;  %v504_v20 = vmul.f32 %v5344_v16, %v5344_v16 }
 0x201   :  { %6046 = vst [vmem:[#allocation45_spill] sm:$0xff] %v5346_v25 }
 0x202   :  { %562 = vadd.xlane.f32.xlu1 %v504_v20 }
 0x203   :  { %v5350_v18 = vpop.f32.mrb[54].mxu0 }
 0x204   :  { %v505_v13 = vmul.f32 %v5350_v18, %v5350_v18  ;;  %v5354_v6 = vpop.f32.mrb[55].mxu0 }
 0x205   :  { %6047 = vst [vmem:[#allocation46_spill] sm:$0xff] %v5354_v6 }
 0x206   :  { %564 = vadd.xlane.f32.xlu0 %v505_v13 }
 0x207   :  { %v5358_v58 = vpop.f32.mrb[56].mxu0 }
 0x208   :  { %v5360_v27 = vpop.f32.mrb[57].mxu0  ;;  %v506_v55 = vmul.f32 %v5358_v58, %v5358_v58 }
 0x209   :  { %6048 = vst [vmem:[#allocation47_spill] sm:$0xff] %v5360_v27 }
 0x20a   :  { %566 = vadd.xlane.f32.xlu1 %v506_v55 }
 0x20b   :  { %v5364_v20 = vpop.f32.mrb[58].mxu0 }
 0x20c   :  { %v507_v44 = vmul.f32 %v5364_v20, %v5364_v20  ;;  %v5368_v0 = vpop.f32.mrb[59].mxu0 }
 0x20d   :  { %6049 = vst [vmem:[#allocation48_spill] sm:$0xff] %v5368_v0 }
 0x20e   :  { %568 = vadd.xlane.f32.xlu0 %v507_v44 }
 0x20f   :  { %v5372_v13 = vpop.f32.mrb[60].mxu0 }
 0x210   :  { %v5374_v62 = vpop.f32.mrb[61].mxu0  ;;  %v508_v26 = vmul.f32 %v5372_v13, %v5372_v13 }
 0x211   :  { %6050 = vst [vmem:[#allocation49_spill] sm:$0xff] %v5374_v62 }
 0x213   :  { %v5376_v25 = vpop.f32.mrb[62].mxu0 }
 0x214   :  { %v5378_v6 = vpop.f32.mrb[63].mxu0 }
 0x215   :  { %6051 = vst [vmem:[#allocation50_spill] sm:$0xff] %v5378_v6 }
 0x227   :  { %v511_v41 = vpop.xlane.xlu0 %510  ;;  %v5382_v2 = vpop.xlane.xlu1 %1086 }
 0x228   :  { %v575_v48 = vmul.f32 0.0078125, %v511_v41 }
 0x22a   :  { %v607_v29 = vadd.f32 1.1920929e-07, %v575_v48 }
 0x22b   :  { %v513_v32 = vpop.xlane.xlu0 %512  ;;  %v1085_v44 = vpop.xlane.xlu1 %1084 }
 0x22c   :  { %4532 = vrsqrt.f32 %v607_v29  ;;  %v576_v34 = vmul.f32 0.0078125, %v513_v32  ;;  %v1088_v27 = vmul.f32 0.0078125, %v1085_v44 }
 0x22e   :  { %v608_v0 = vadd.f32 1.1920929e-07, %v576_v34  ;;  %v1090_v5 = vadd.f32 1.1920929e-07, %v1088_v27 }
 0x22f   :  { %v515_v12 = vpop.xlane.xlu1 %514 }
 0x230   :  { %4534 = vrsqrt.f32 %v1090_v5  ;;  %v577_v43 = vmul.f32 0.0078125, %v515_v12 }
 0x231   :  { %4536 = vrsqrt.f32 %v608_v0 }
 0x232   :  { %v609_v54 = vadd.f32 1.1920929e-07, %v577_v43 }
 0x233   :  { %v517_v36 = vpop.xlane.xlu0 %516 }
 0x234   :  { %v578_v40 = vmul.f32 0.0078125, %v517_v36  ;;  %4538 = vrsqrt.f32 %v609_v54 }
 0x236   :  { %v4533_v55 = vpop.eup %4532  ;;  %v610_v41 = vadd.f32 1.1920929e-07, %v578_v40 }
 0x237   :  { %v519_v62 = vpop.xlane.xlu1 %518  ;;  %v5385_v48 = vmul.f32 %v4533_v55, %v5159_v45 }
 0x238   :  { %4540 = vrsqrt.f32 %v610_v41  ;;  %v579_v29 = vmul.f32 0.0078125, %v519_v62 }
 0x239   :  { %799 = vrot.lane.b32.xlu0 %v5385_v48, %s4911_s8 }
 0x23a   :  { %v611_v27 = vadd.f32 1.1920929e-07, %v579_v29  ;;  %v4535_v5 = vpop.eup %4534  ;;  %v6052_v29 = vmov 0.0  }
 0x23b   :  { %v521_v12 = vpop.xlane.xlu0 %520  ;;  %v5390_v36 = vmul.f32 %v4535_v5, %v5169_v50  ;;  %v4537_v43 = vpop.eup %4536  ;;  %4066 = vmatprep.mubr.msk.f32.mxu1 %vm4912_vm0, %v6052_v29  ;;  %4220 = vmatprep.mubr.msk.f32.mxu0 %vm4912_vm0, %v6052_v29 }
 0x23c   :  { %4542 = vrsqrt.f32 %v611_v27  ;;  %v580_v0 = vmul.f32 0.0078125, %v521_v12  ;;  %v5395_v32 = vmul.f32 %v4537_v43, %v5171_v51 }
 0x23d   :  { %1102 = vrot.lane.b32.xlu1 %v5390_v36, %s4911_s8 }
 0x23e   :  { %v612_v40 = vadd.f32 1.1920929e-07, %v580_v0  ;;  %v4539_v45 = vpop.eup %4538 }
 0x23f   :  { %v523_v54 = vpop.xlane.xlu1 %522  ;;  %v5398_v34 = vmul.f32 %v4539_v45, %v5181_v56 }
 0x240   :  { %4544 = vrsqrt.f32 %v612_v40  ;;  %v581_v62 = vmul.f32 0.0078125, %v523_v54  ;;  %v509_v54 = vmul.f32 %v5376_v25, %v5376_v25 }
 0x241   :  { %801 = vrot.lane.b32.xlu1 %v5395_v32, %s4911_s8  ;;  %803 = vrot.lane.b32.xlu0 %v5398_v34, %s4911_s8 }
 0x242   :  { %v4541_v55 = vpop.eup %4540  ;;  %v613_v44 = vadd.f32 1.1920929e-07, %v581_v62 }
 0x243   :  { %v525_v50 = vpop.xlane.xlu0 %524  ;;  %v5405_v41 = vmul.f32 %v4541_v55, %v5187_v59 }
 0x244   :  { %4546 = vrsqrt.f32 %v613_v44  ;;  %v582_v51 = vmul.f32 0.0078125, %v525_v50 }
 0x245   :  { %805 = vrot.lane.b32.xlu1 %v5405_v41, %s4911_s8 }
 0x246   :  { %v4543_v56 = vpop.eup %4542  ;;  %v614_v27 = vadd.f32 1.1920929e-07, %v582_v51 }
 0x247   :  { %v5414_v5 = vmul.f32 %v4543_v56, %v5195_v63  ;;  %v527_v45 = vpop.xlane.xlu1 %526 }
 0x248   :  { %4548 = vrsqrt.f32 %v614_v27  ;;  %v583_v44 = vmul.f32 0.0078125, %v527_v45 }
 0x249   :  { %807 = vrot.lane.b32.xlu0 %v5414_v5, %s4911_s8 }
 0x24a   :  { %v4545_v59 = vpop.eup %4544  ;;  %v615_v56 = vadd.f32 1.1920929e-07, %v583_v44 }
 0x24b   :  { %v5419_v12 = vmul.f32 %v4545_v59, %v5201_v3  ;;  %v529_v3 = vpop.xlane.xlu0 %528 }
 0x24c   :  { %4550 = vrsqrt.f32 %v615_v56 }
 0x24d   :  { %809 = vrot.lane.b32.xlu1 %v5419_v12, %s4911_s8 }
 0x24e   :  { %v4547_v0 = vpop.eup %4546 }
 0x24f   :  { %v5424_v43 = vmul.f32 %v4547_v0, %v5209_v7  ;;  %v531_v62 = vpop.xlane.xlu1 %530  ;;  %v584_v7 = vmul.f32 0.0078125, %v529_v3 }
 0x251   :  { %811 = vrot.lane.b32.xlu0 %v5424_v43, %s4911_s8  ;;  %v616_v59 = vadd.f32 1.1920929e-07, %v584_v7 }
 0x252   :  { %v4549_v63 = vpop.eup %4548 }
 0x253   :  { %v5429_v40 = vmul.f32 %v4549_v63, %v5215_v10  ;;  %v533_v55 = vpop.xlane.xlu0 %532  ;;  %v585_v10 = vmul.f32 0.0078125, %v531_v62  ;;  %4552 = vrsqrt.f32 %v616_v59 }
 0x254   :  { %v586_v27 = vmul.f32 0.0078125, %v533_v55 }
 0x255   :  { %813 = vrot.lane.b32.xlu1 %v5429_v40, %s4911_s8  ;;  %v617_v15 = vadd.f32 1.1920929e-07, %v585_v10 }
 0x256   :  { %v618_v6 = vadd.f32 1.1920929e-07, %v586_v27  ;;  %v4551_v8 = vpop.eup %4550 }
 0x257   :  { %v535_v50 = vpop.xlane.xlu1 %534 }
 0x258   :  { %v587_v45 = vmul.f32 0.0078125, %v535_v50  ;;  %4554 = vrsqrt.f32 %v618_v6 }
 0x259   :  { %4556 = vrsqrt.f32 %v617_v15 }
 0x25a   :  { %v619_v55 = vadd.f32 1.1920929e-07, %v587_v45 }
 0x25b   :  { %v537_v51 = vpop.xlane.xlu0 %536 }
 0x25c   :  { %v588_v22 = vmul.f32 0.0078125, %v537_v51 }
 0x25d   :  { %v4553_v1 = vpop.eup %4552 }
 0x25e   :  { %v620_v19 = vadd.f32 1.1920929e-07, %v588_v22  ;;  %v5438_v22 = vmul.f32 %v4551_v8, %v5223_v14 }
 0x25f   :  { %v539_v0 = vpop.xlane.xlu1 %538 }
 0x260   :  { %v589_v62 = vmul.f32 0.0078125, %v539_v0  ;;  %4558 = vrsqrt.f32 %v620_v19  ;;  %v1089_v0 = vmul.f32 0.0078125, %v5382_v2 }
 0x261   :  { %4560 = vrsqrt.f32 %v619_v55  ;;  %v5444_v55 = vmul.f32 %v4553_v1, %v5229_v17 }
 0x262   :  { %v621_v11 = vadd.f32 1.1920929e-07, %v589_v62  ;;  %v4555_v15 = vpop.eup %4554  ;;  %v1091_v62 = vadd.f32 1.1920929e-07, %v1089_v0 }
 0x263   :  { %v541_v63 = vpop.xlane.xlu0 %540  ;;  %v5447_v8 = vmul.f32 %v4555_v15, %v5243_v24 }
 0x264   :  { %v590_v44 = vmul.f32 0.0078125, %v541_v63 }
 0x266   :  { %v622_v56 = vadd.f32 1.1920929e-07, %v590_v44 }
 0x268   :  { %4562 = vrsqrt.f32 %v622_v56 }
 0x269   :  { %4564 = vrsqrt.f32 %v621_v11 }
 0x26b   :  { %v545_v3 = vpop.xlane.xlu0 %544 }
 0x26c   :  { %v592_v27 = vmul.f32 0.0078125, %v545_v3  ;;  %v4557_v3 = vpop.eup %4556 }
 0x26d   :  { %v4559_v14 = vpop.eup %4558  ;;  %v5457_v17 = vmul.f32 %v4557_v3, %v5237_v21 }
 0x26e   :  { %v624_v50 = vadd.f32 1.1920929e-07, %v592_v27  ;;  %v4561_v27 = vpop.eup %4560  ;;  %v5454_v1 = vmul.f32 %v4559_v14, %v5255_v31 }
 0x26f   :  { %v547_v51 = vpop.xlane.xlu0 %546  ;;  %v5467_v21 = vmul.f32 %v4561_v27, %v5251_v28 }
 0x270   :  { %572 = vadd.xlane.f32.xlu0 %v509_v54  ;;  %v543_v54 = vpop.xlane.xlu1 %542  ;;  %v593_v10 = vmul.f32 0.0078125, %v547_v51  ;;  %4566 = vrsqrt.f32 %v624_v50 }
 0x272   :  { %v625_v45 = vadd.f32 1.1920929e-07, %v593_v10  ;;  %v4563_v24 = vpop.eup %4562 }
 0x273   :  { %v5464_v31 = vmul.f32 %v4563_v24, %v5266_v38 }
 0x274   :  { %v549_v7 = vpop.xlane.xlu1 %548 }
 0x275   :  { %v594_v11 = vmul.f32 0.0078125, %v549_v7 }
 0x277   :  { %v551_v6 = vpop.xlane.xlu0 %550  ;;  %v626_v7 = vadd.f32 1.1920929e-07, %v594_v11 }
 0x279   :  { %570 = vadd.xlane.f32.xlu1 %v508_v26  ;;  %v591_v26 = vmul.f32 0.0078125, %v543_v54  ;;  %v595_v54 = vmul.f32 0.0078125, %v551_v6  ;;  %v4565_v6 = vpop.eup %4564 }
 0x27a   :  { %v4567_v0 = vpop.eup %4566  ;;  %v5477_v28 = vmul.f32 %v4565_v6, %v5259_v35 }
 0x27b   :  { %v553_v59 = vpop.xlane.xlu1 %552  ;;  %v623_v19 = vadd.f32 1.1920929e-07, %v591_v26  ;;  %v627_v2 = vadd.f32 1.1920929e-07, %v595_v54  ;;  %v5474_v38 = vmul.f32 %v4567_v0, %v5280_v49 }
 0x27c   :  { %v596_v26 = vmul.f32 0.0078125, %v553_v59 }
 0x27d   :  { %4568 = vrsqrt.f32 %v623_v19 }
 0x27e   :  { %4570 = vrsqrt.f32 %v625_v45  ;;  %v628_v59 = vadd.f32 1.1920929e-07, %v596_v26 }
 0x27f   :  { %v555_v44 = vpop.xlane.xlu0 %554  ;;  %4572 = vrsqrt.f32 %v1091_v62 }
 0x280   :  { %v597_v56 = vmul.f32 0.0078125, %v555_v44  ;;  %4574 = vrsqrt.f32 %v627_v2 }
 0x281   :  { %4576 = vrsqrt.f32 %v626_v7 }
 0x282   :  { %v629_v50 = vadd.f32 1.1920929e-07, %v597_v56 }
 0x283   :  { %v557_v63 = vpop.xlane.xlu1 %556 }
 0x284   :  { %v598_v19 = vmul.f32 0.0078125, %v557_v63  ;;  %4578 = vrsqrt.f32 %v629_v50 }
 0x285   :  { %4580 = vrsqrt.f32 %v628_v59 }
 0x286   :  { %815 = vrot.lane.b32.xlu0 %v5438_v22, %s4911_s8  ;;  %v630_v63 = vadd.f32 1.1920929e-07, %v598_v19 }
 0x287   :  { %v559_v51 = vpop.xlane.xlu1 %558  ;;  %v4569_v44 = vpop.eup %4568 }
 0x288   :  { %v599_v10 = vmul.f32 0.0078125, %v559_v51  ;;  %v4571_v14 = vpop.eup %4570  ;;  %v5487_v35 = vmul.f32 %v4569_v44, %v5274_v42 }
 0x289   :  { %v4573_v56 = vpop.eup %4572  ;;  %v5484_v51 = vmul.f32 %v4571_v14, %v5288_v61 }
 0x28a   :  { %817 = vrot.lane.b32.xlu1 %v5444_v55, %s4911_s8  ;;  %821 = vrot.lane.b32.xlu0 %v5447_v8, %s4911_s8  ;;  %v631_v45 = vadd.f32 1.1920929e-07, %v599_v10  ;;  %v4575_v24 = vpop.eup %4574  ;;  %v5497_v42 = vmul.f32 %v4573_v56, %v5161_v46 }
 0x28b   :  { %v561_v54 = vpop.xlane.xlu0 %560  ;;  %v4577_v10 = vpop.eup %4576  ;;  %v5494_v61 = vmul.f32 %v4575_v24, %v5302_v23 }
 0x28c   :  { %v600_v62 = vmul.f32 0.0078125, %v561_v54  ;;  %4582 = vrsqrt.f32 %v631_v45  ;;  %v5507_v23 = vmul.f32 %v4577_v10, %v5294_v9  ;;  %v704_v10 = vld [vmem:[#allocation13 + $0x8] sm:$0xff] }
 0x28d   :  { %4584 = vrsqrt.f32 %v630_v63 }
 0x28e   :  { %825 = vrot.lane.b32.xlu0 %v5454_v1, %s4911_s8  ;;  %819 = vrot.lane.b32.xlu1 %v5457_v17, %s4911_s8  ;;  %v632_v7 = vadd.f32 1.1920929e-07, %v600_v62 }
 0x28f   :  { %v563_v15 = vpop.xlane.xlu1 %562 }
 0x290   :  { %v601_v3 = vmul.f32 0.0078125, %v563_v15  ;;  %v4579_v15 = vpop.eup %4578 }
 0x291   :  { %v4581_v19 = vpop.eup %4580  ;;  %v5504_v45 = vmul.f32 %v4579_v15, %v5316_v37  ;;  %v1096_v15 = vld [vmem:[#allocation10] sm:$0xff] }
 0x292   :  { %829 = vrot.lane.b32.xlu0 %v5464_v31, %s4911_s8  ;;  %823 = vrot.lane.b32.xlu1 %v5467_v21, %s4911_s8  ;;  %v633_v11 = vadd.f32 1.1920929e-07, %v601_v3  ;;  %v5514_v44 = vmul.f32 %v4581_v19, %v5308_v30  ;;  %v737_v19 = vld [vmem:[#allocation14 + $0x10] sm:$0xff] }
 0x293   :  { %v565_v27 = vpop.xlane.xlu0 %564 }
 0x294   :  { %4586 = vrsqrt.f32 %v633_v11  ;;  %v602_v26 = vmul.f32 0.0078125, %v565_v27  ;;  %v1120_v27 = vlaneseq }
 0x295   :  { %4588 = vrsqrt.f32 %v632_v7  ;;  %v735_v7 = vld [vmem:[#allocation14] sm:$0xff] }
 0x296   :  { %833 = vrot.lane.b32.xlu0 %v5474_v38, %s4911_s8  ;;  %827 = vrot.lane.b32.xlu1 %v5477_v28, %s4911_s8  ;;  %v634_v0 = vadd.f32 1.1920929e-07, %v602_v26  ;;  %v4583_v46 = vpop.eup %4582  ;;  %v1098_v26 = vld [vmem:[#allocation11] sm:$0xff] }
 0x297   :  { %v567_v2 = vpop.xlane.xlu1 %566  ;;  %v4585_v3 = vpop.eup %4584  ;;  %v5517_v14 = vmul.f32 %v4583_v46, %v5330_v33 }
 0x298   :  { %v603_v49 = vmul.f32 0.0078125, %v567_v2  ;;  %v5524_v63 = vmul.f32 %v4585_v3, %v5322_v52 }
 0x29a   :  { %835 = vrot.lane.b32.xlu0 %v5484_v51, %s4911_s8  ;;  %831 = vrot.lane.b32.xlu1 %v5487_v35, %s4911_s8  ;;  %v635_v50 = vadd.f32 1.1920929e-07, %v603_v49 }
 0x29b   :  { %v569_v6 = vpop.xlane.xlu0 %568 }
 0x29c   :  { %4590 = vrsqrt.f32 %v635_v50  ;;  %v604_v59 = vmul.f32 0.0078125, %v569_v6  ;;  %v703_v50 = vld [vmem:[#allocation13] sm:$0xff] }
 0x29d   :  { %4592 = vrsqrt.f32 %v634_v0 }
 0x29e   :  { %839 = vrot.lane.b32.xlu0 %v5494_v61, %s4911_s8  ;;  %1104 = vrot.lane.b32.xlu1 %v5497_v42, %s4911_s8  ;;  %v636_v54 = vadd.f32 1.1920929e-07, %v604_v59  ;;  %v4587_v37 = vpop.eup %4586  ;;  %v1121_v59 = vshrl.u32 %v1120_v27, 7 }
 0x29f   :  { %v4589_v9 = vpop.eup %4588  ;;  %v5527_v62 = vmul.f32 %v4587_v37, %v5344_v16  ;;  %v4913_v16 = vmov 1966171168  }
 0x2a0   :  { %4594 = vrsqrt.f32 %v636_v54  ;;  %v5534_v33 = vmul.f32 %v4589_v9, %v5336_v39  ;;  %v1118_v56 = vunpack.c.l.s4 %v4913_v16  ;;  %v895_v9 = vmul.f32 %v703_v50, %v5385_v48  ;;  %v738_v16 = vld [vmem:[#allocation14 + $0x18] sm:$0xff] }
 0x2a2   :  { %843 = vrot.lane.b32.xlu0 %v5504_v45, %s4911_s8  ;;  %837 = vrot.lane.b32.xlu1 %v5507_v23, %s4911_s8  ;;  %v1119_v0 = vunpack.c.0.s8 %v1118_v56  ;;  %v1108_v56 = vmul.f32 %v1096_v15, %v5390_v36  ;;  %v707_v15 = vld [vmem:[#allocation13 + $0x20] sm:$0xff] }
 0x2a4   :  { %v5556_v4 = vsub.s32 %v1119_v0, %v1121_v59  ;;  %v708_v0 = vld [vmem:[#allocation13 + $0x28] sm:$0xff] }
 0x2a5   :  { %v740_v59 = vld [vmem:[#allocation14 + $0x28] sm:$0xff] }
 0x2a6   :  { %841 = vrot.lane.b32.xlu1 %v5514_v44, %s4911_s8  ;;  %847 = vrot.lane.b32.xlu0 %v5517_v14, %s4911_s8  ;;  %v4591_v30 = vpop.eup %4590 }
 0x2a7   :  { %v5537_v11 = vmul.f32 %v4591_v30, %v5358_v58  ;;  %v4593_v2 = vpop.eup %4592  ;;  %v736_v58 = vld [vmem:[#allocation14 + $0x8] sm:$0xff]  ;;  %v705_v30 = vld [vmem:[#allocation13 + $0x10] sm:$0xff] }
 0x2a8   :  { %v5544_v24 = vmul.f32 %v4593_v2, %v5350_v18  ;;  %v896_v2 = vmul.f32 %v704_v10, %v5395_v32  ;;  %v897_v48 = vmul.f32 %v705_v30, %v5398_v34 }
 0x2aa   :  { %845 = vrot.lane.b32.xlu1 %v5524_v63, %s4911_s8  ;;  %851 = vrot.lane.b32.xlu0 %v5527_v62, %s4911_s8  ;;  %v4595_v39 = vpop.eup %4594 }
 0x2ab   :  { %v800_v52 = vpop.permute.xlu0 %799  ;;  %v5549_v3 = vmul.f32 %v4595_v39, %v5364_v20 }
 0x2ac   :  { %v927_v6 = vmul.f32 %v800_v52, %v735_v7  ;;  %v706_v52 = vld [vmem:[#allocation13 + $0x18] sm:$0xff] }
 0x2ae   :  { %849 = vrot.lane.b32.xlu1 %v5534_v33, %s4911_s8  ;;  %855 = vrot.lane.b32.xlu0 %v5537_v11, %s4911_s8  ;;  %v959_v7 = vadd.f32 %v927_v6, %v895_v9 }
 0x2af   :  { %v1103_v49 = vpop.permute.xlu1 %1102 }
 0x2b0   :  { %v1110_v18 = vmul.f32 %v1103_v49, %v1098_v26  ;;  %v898_v26 = vmul.f32 %v706_v52, %v5405_v41  ;;  %v899_v41 = vmul.f32 %v707_v15, %v5414_v5  ;;  %v741_v52 = vld [vmem:[#allocation14 + $0x30] sm:$0xff] }
 0x2b2   :  { %853 = vrot.lane.b32.xlu1 %v5544_v24, %s4911_s8  ;;  %v5558_v49 = vadd.f32 %v1110_v18, %v1108_v56  ;;  %v900_v18 = vmul.f32 %v708_v0, %v5419_v12 }
 0x2b3   :  { %v804_v46 = vpop.permute.xlu0 %803  ;;  %v802_v54 = vpop.permute.xlu1 %801 }
 0x2b4   :  { %v928_v37 = vmul.f32 %v802_v54, %v736_v58  ;;  %v929_v27 = vmul.f32 %v804_v46, %v737_v19  ;;  %v739_v54 = vld [vmem:[#allocation14 + $0x20] sm:$0xff]  ;;  %v1123_v36 = vrot.slane %v5558_v49, %v5556_v4  ;;  %v6053_v19 = vmov 0.0|0.0  }
 0x2b6   :  { %857 = vrot.lane.b32.xlu1 %v5549_v3, %s4911_s8  ;;  %v960_v20 = vadd.f32 %v928_v37, %v896_v2  ;;  %v961_v50 = vadd.f32 %v929_v27, %v897_v48  ;;  %v1139_v9 = vrot.slane %v1123_v36, %v5556_v4  ;;  %v1131_v27 = vcombine.high %v1123_v36, %v1123_v36 }
 0x2b7   :  { %v806_v39 = vpop.permute.xlu1 %805 }
 0x2b8   :  { %v930_v32 = vmul.f32 %v806_v39, %v738_v16  ;;  %v4386_v58 = vpack.c.bf16 %v960_v20, %v959_v7  ;;  %v710_v7 = vld [vmem:[#allocation13 + $0x38] sm:$0xff] }
 0x2b9   :  { %v742_v20 = vld [vmem:[#allocation14 + $0x38] sm:$0xff]  ;;  %v902_v48 = vmul.f32 %v710_v7, %v5429_v40 }
 0x2ba   :  { %v962_v10 = vadd.f32 %v930_v32, %v898_v26  ;;  %4387 = vmatpush3.bf16.xpose.msra.mxu1 %v4386_v58  ;;  %v1153_v32 = vrot.slane %v1131_v27, %v5556_v4 }
 0x2bb   :  { %v808_v57 = vpop.permute.xlu0 %807  ;;  %4388 = vmatprep.subr.bf16.mxu1 %v6053_v19 }
 0x2bc   :  { %v4389_v6 = vpack.c.bf16 %v962_v10, %v961_v50  ;;  %v931_v46 = vmul.f32 %v808_v57, %v739_v54  ;;  %v709_v57 = vld [vmem:[#allocation13 + $0x30] sm:$0xff]  ;;  %v1161_v54 = vcombine.high %v1139_v9, %v1139_v9 }
 0x2bd   :  { %v901_v39 = vmul.f32 %v709_v57, %v5424_v43  ;;  %v1163_v43 = vcombine.high %v1153_v32, %v1153_v32 }
 0x2be   :  { %v963_v30 = vadd.f32 %v931_v46, %v899_v41  ;;  %v711_v41 = vld [vmem:[#allocation13 + $0x40] sm:$0xff] }
 0x2bf   :  { %v810_v34 = vpop.permute.xlu1 %809 }
 0x2c0   :  { %v932_v37 = vmul.f32 %v810_v34, %v740_v59  ;;  %v743_v59 = vld [vmem:[#allocation14 + $0x40] sm:$0xff] }
 0x2c1   :  { %4067 = vmatmul.mubr.f32.vlgmr.msra.gmra.mrb[2].mxu1 %v1139_v9 }
 0x2c2   :  { %v964_v2 = vadd.f32 %v932_v37, %v900_v18  ;;  %4390 = vmatpush3.bf16.xpose.msra.mxu1 %v4389_v6  ;;  %4073 = vmatprep.mubr.msk.f32.mxu1 %vm4912_vm0, %v6052_v29  ;;  %v712_v18 = vld [vmem:[#allocation13 + $0x48] sm:$0xff] }
 0x2c3   :  { %v812_v16 = vpop.permute.xlu0 %811  ;;  %4391 = vmatprep.subr.bf16.mxu1 %v6053_v19  ;;  %v744_v37 = vld [vmem:[#allocation14 + $0x48] sm:$0xff]  ;;  %v904_v27 = vmul.f32 %v712_v18, %v5444_v55 }
 0x2c4   :  { %v4392_v56 = vpack.c.bf16 %v964_v2, %v963_v30  ;;  %v933_v5 = vmul.f32 %v812_v16, %v741_v52  ;;  %v746_v52 = vld [vmem:[#allocation14 + $0x58] sm:$0xff] }
 0x2c6   :  { %v965_v58 = vadd.f32 %v933_v5, %v901_v39  ;;  %v713_v5 = vld [vmem:[#allocation13 + $0x50] sm:$0xff] }
 0x2c7   :  { %v814_v12 = vpop.permute.xlu1 %813 }
 0x2c8   :  { %v934_v26 = vmul.f32 %v814_v12, %v742_v20  ;;  %v714_v20 = vld [vmem:[#allocation13 + $0x58] sm:$0xff]  ;;  %v745_v12 = vld [vmem:[#allocation14 + $0x50] sm:$0xff] }
 0x2c9   :  { %4074 = vmatmul.mubr.f32.vlgmr.msra.gmra.mrb[4].mxu1 %v1153_v32 }
 0x2ca   :  { %v966_v50 = vadd.f32 %v934_v26, %v902_v48  ;;  %4393 = vmatpush3.bf16.xpose.msra.mxu1 %v4392_v56  ;;  %4080 = vmatprep.mubr.msk.f32.mxu1 %vm4912_vm0, %v6052_v29  ;;  %v903_v56 = vmul.f32 %v711_v41, %v5438_v22 }
 0x2cb   :  { %4394 = vmatprep.subr.bf16.mxu1 %v6053_v19 }
 0x2cc   :  { %v4395_v10 = vpack.c.bf16 %v966_v50, %v965_v58  ;;  %v1116_v50 = vcombine.high %v5558_v49, %v5558_v49 }
 0x2ce   :  { %v1130_v49 = vrot.slane %v1116_v50, %v5556_v4  ;;  %v751_v50 = vld [vmem:[#allocation14 + $0x80] sm:$0xff] }
 0x2d1   :  { %4081 = vmatmul.mubr.f32.vlgmr.msra.gmra.mrb[6].mxu1 %v1161_v54  ;;  %v906_v54 = vmul.f32 %v714_v20, %v5447_v8 }
 0x2d2   :  { %4396 = vmatpush3.bf16.xpose.msra.mxu1 %v4395_v10  ;;  %4087 = vmatprep.mubr.msk.f32.mxu1 %vm4912_vm0, %v6052_v29  ;;  %v748_v10 = vld [vmem:[#allocation14 + $0x68] sm:$0xff] }
 0x2d3   :  { %4397 = vmatprep.subr.bf16.mxu1 %v6053_v19 }
 0x2d9   :  { %4088 = vmatmul.mubr.f32.vlgmr.msra.gmra.mrb[8].mxu1 %v1163_v43  ;;  %v905_v43 = vmul.f32 %v713_v5, %v5457_v17 }
 0x2da   :  { %4094 = vmatprep.mubr.msk.f32.mxu1 %vm4912_vm0, %v6052_v29 }
 0x2fd   :  { %v573_v40 = vpop.xlane.xlu0 %572 }
 0x2fe   :  { %v606_v36 = vmul.f32 0.0078125, %v573_v40 }
 0x300   :  { %v638_v6 = vadd.f32 1.1920929e-07, %v606_v36  ;;  %v716_v36 = vld [vmem:[#allocation13 + $0x68] sm:$0xff] }
 0x301   :  { %v816_v15 = vpop.permute.xlu0 %815  ;;  %v908_v8 = vmul.f32 %v716_v36, %v5454_v1 }
 0x302   :  { %4596 = vrsqrt.f32 %v638_v6  ;;  %v935_v9 = vmul.f32 %v816_v15, %v743_v59  ;;  %v715_v6 = vld [vmem:[#allocation13 + $0x60] sm:$0xff] }
 0x303   :  { %v747_v15 = vld [vmem:[#allocation14 + $0x60] sm:$0xff]  ;;  %v907_v18 = vmul.f32 %v715_v6, %v5467_v21 }
 0x304   :  { %v967_v39 = vadd.f32 %v935_v9, %v903_v56  ;;  %v718_v9 = vld [vmem:[#allocation13 + $0x78] sm:$0xff] }
 0x305   :  { %v822_v0 = vpop.permute.xlu0 %821  ;;  %v910_v1 = vmul.f32 %v718_v9, %v5464_v31 }
 0x306   :  { %v571_v46 = vpop.xlane.xlu1 %570  ;;  %v938_v48 = vmul.f32 %v822_v0, %v746_v52  ;;  %v749_v52 = vld [vmem:[#allocation14 + $0x70] sm:$0xff] }
 0x307   :  { %v605_v34 = vmul.f32 0.0078125, %v571_v46 }
 0x308   :  { %v970_v0 = vadd.f32 %v938_v48, %v906_v54 }
 0x309   :  { %v637_v30 = vadd.f32 1.1920929e-07, %v605_v34  ;;  %v826_v2 = vpop.permute.xlu0 %825  ;;  %v750_v34 = vld [vmem:[#allocation14 + $0x78] sm:$0xff] }
 0x30a   :  { %v818_v16 = vpop.permute.xlu1 %817 }
 0x30b   :  { %4598 = vrsqrt.f32 %v637_v30  ;;  %v936_v57 = vmul.f32 %v818_v16, %v744_v37  ;;  %v717_v30 = vld [vmem:[#allocation13 + $0x70] sm:$0xff] }
 0x30c   :  { %v4597_v7 = vpop.eup %4596  ;;  %v909_v21 = vmul.f32 %v717_v30, %v5477_v28  ;;  %v723_v30 = vld [vmem:[#allocation13 + $0xa0] sm:$0xff] }
 0x30d   :  { %v968_v26 = vadd.f32 %v936_v57, %v904_v27  ;;  %v830_v32 = vpop.permute.xlu0 %829  ;;  %v5585_v58 = vmul.f32 %v4597_v7, %v5376_v25  ;;  %v940_v25 = vmul.f32 %v826_v2, %v748_v10  ;;  %v752_v7 = vld [vmem:[#allocation14 + $0x88] sm:$0xff] }
 0x30e   :  { %v820_v22 = vpop.permute.xlu1 %819  ;;  %v942_v56 = vmul.f32 %v830_v32, %v750_v34  ;;  %v719_v32 = vld [vmem:[#allocation13 + $0x80] sm:$0xff] }
 0x30f   :  { %v4398_v55 = vpack.c.bf16 %v968_v26, %v967_v39  ;;  %v937_v40 = vmul.f32 %v820_v22, %v745_v12  ;;  %861 = vrot.lane.b32.xlu1 %v5585_v58, %s4911_s8  ;;  %v972_v2 = vadd.f32 %v940_v25, %v908_v8  ;;  %v1146_v12 = vrot.slane %v1130_v49, %v5556_v4  ;;  %v720_v26 = vld [vmem:[#allocation13 + $0x88] sm:$0xff]  ;;  %v755_v8 = vld [vmem:[#allocation14 + $0xa0] sm:$0xff] }
 0x310   :  { %v974_v10 = vadd.f32 %v942_v56, %v910_v1  ;;  %v912_v28 = vmul.f32 %v720_v26, %v5474_v38  ;;  %v722_v38 = vld [vmem:[#allocation13 + $0x98] sm:$0xff]  ;;  %v725_v26 = vld [vmem:[#allocation13 + $0xb0] sm:$0xff] }
 0x311   :  { %v969_v59 = vadd.f32 %v937_v40, %v905_v43  ;;  %v834_v46 = vpop.permute.xlu0 %833  ;;  %4399 = vmatpush3.bf16.xpose.msra.mxu1 %v4398_v55  ;;  %v911_v40 = vmul.f32 %v719_v32, %v5487_v35  ;;  %v1162_v1 = vcombine.high %v1146_v12, %v1146_v12  ;;  %v726_v32 = vld [vmem:[#allocation13 + $0xb8] sm:$0xff] }
 0x312   :  { %v824_v41 = vpop.permute.xlu1 %823  ;;  %4400 = vmatprep.subr.bf16.mxu1 %v6053_v19  ;;  %v944_v22 = vmul.f32 %v834_v46, %v752_v7 }
 0x313   :  { %v4401_v17 = vpack.c.bf16 %v970_v0, %v969_v59  ;;  %v939_v37 = vmul.f32 %v824_v41, %v747_v15  ;;  %v753_v0 = vld [vmem:[#allocation14 + $0x90] sm:$0xff]  ;;  %v754_v41 = vld [vmem:[#allocation14 + $0x98] sm:$0xff] }
 0x314   :  { %v5610_v6 = vadd.f32 %v944_v22, %v912_v28  ;;  %v918_v28 = vmul.f32 %v726_v32, %v5524_v63 }
 0x315   :  { %v4599_v16 = vpop.eup %4598  ;;  %v971_v27 = vadd.f32 %v939_v37, %v907_v18  ;;  %v836_v57 = vpop.permute.xlu0 %835  ;;  %v914_v37 = vmul.f32 %v722_v38, %v5507_v23 }
 0x316   :  { %v828_v20 = vpop.permute.xlu1 %827  ;;  %v5598_v5 = vmul.f32 %v4599_v16, %v5372_v13  ;;  %v1132_v13 = vcombine.high %v1130_v49, %v1130_v49  ;;  %v721_v49 = vld [vmem:[#allocation13 + $0x90] sm:$0xff]  ;;  %v945_v35 = vmul.f32 %v836_v57, %v753_v0  ;;  %v756_v16 = vld [vmem:[#allocation14 + $0xa8] sm:$0xff]  ;;  %v727_v0 = vld [vmem:[#allocation13 + $0xc0] sm:$0xff] }
 0x317   :  { %v4404_v39 = vpack.c.bf16 %v972_v2, %v971_v27  ;;  %v941_v48 = vmul.f32 %v828_v20, %v749_v52  ;;  %v913_v18 = vmul.f32 %v721_v49, %v5484_v51  ;;  %v724_v52 = vld [vmem:[#allocation13 + $0xa8] sm:$0xff]  ;;  %v757_v57 = vld [vmem:[#allocation14 + $0xb0] sm:$0xff] }
 0x318   :  { %859 = vrot.lane.b32.xlu0 %v5598_v5, %s4911_s8  ;;  %4095 = vmatmul.mubr.f32.vlgmr.msra.gmra.mrb[10].mxu1 %v1146_v12  ;;  %v5615_v59 = vrot.slane %v1132_v13, %v5556_v4  ;;  %v916_v23 = vmul.f32 %v724_v52, %v5514_v44  ;;  %v759_v12 = vld [vmem:[#allocation14 + $0xc0] sm:$0xff]  ;;  %v917_v44 = vmul.f32 %v725_v26, %v5504_v45  ;;  %v728_v49 = vld [vmem:[#allocation13 + $0xc8] sm:$0xff]  ;;  %v762_v52 = vld [vmem:[#allocation14 + $0xd8] sm:$0xff] }
 0x319   :  { %v973_v54 = vadd.f32 %v941_v48, %v909_v21  ;;  %4402 = vmatpush3.bf16.xpose.msra.mxu1 %v4401_v17  ;;  %4101 = vmatprep.mubr.msk.f32.mxu1 %vm4912_vm0, %v6052_v29  ;;  %v840_v31 = vpop.permute.xlu0 %839  ;;  %v5625_v2 = vadd.f32 %v945_v35, %v913_v18  ;;  %v1099_v21 = vld [vmem:[#allocation11 + $0x8] sm:$0xff]  ;;  %v919_v18 = vmul.f32 %v727_v0, %v5517_v14 }
 0x31a   :  { %v832_v55 = vpop.permute.xlu1 %831  ;;  %4403 = vmatprep.subr.bf16.mxu1 %v6053_v19  ;;  %v947_v56 = vmul.f32 %v840_v31, %v755_v8  ;;  %v761_v8 = vld [vmem:[#allocation14 + $0xd0] sm:$0xff]  ;;  %v1164_v45 = vcombine.high %v5615_v59, %v5615_v59  ;;  %v920_v63 = vmul.f32 %v728_v49, %v5534_v33  ;;  %v734_v0 = vld [vmem:[#allocation13 + $0xf8] sm:$0xff] }
 0x31b   :  { %v4407_v43 = vpack.c.bf16 %v974_v10, %v973_v54  ;;  %v943_v36 = vmul.f32 %v832_v55, %v751_v50  ;;  %v758_v50 = vld [vmem:[#allocation14 + $0xb8] sm:$0xff]  ;;  %v1097_v54 = vld [vmem:[#allocation10 + $0x8] sm:$0xff]  ;;  %v765_v49 = vld [vmem:[#allocation14 + $0xf0] sm:$0xff] }
 0x31d   :  { %v5612_v15 = vadd.f32 %v943_v36, %v911_v40  ;;  %v844_v34 = vpop.permute.xlu0 %843  ;;  %v1109_v36 = vmul.f32 %v1097_v54, %v5497_v42  ;;  %v729_v42 = vld [vmem:[#allocation13 + $0xd0] sm:$0xff] }
 0x31e   :  { %v1105_v25 = vpop.permute.xlu1 %1104  ;;  %v949_v22 = vmul.f32 %v844_v34, %v757_v57  ;;  %v760_v34 = vld [vmem:[#allocation14 + $0xc8] sm:$0xff] }
 0x31f   :  { %v4410_v46 = vpack.c.bf16 %v5610_v6, %v5612_v15  ;;  %v764_v6 = vld [vmem:[#allocation14 + $0xe8] sm:$0xff] }
 0x320   :  { %4102 = vmatmul.mubr.f32.vlgmr.msra.gmra.mrb[12].mxu1 %v5615_v59  ;;  %v981_v38 = vadd.f32 %v949_v22, %v917_v44  ;;  %v763_v59 = vld [vmem:[#allocation14 + $0xe0] sm:$0xff] }
 0x321   :  { %4405 = vmatpush3.bf16.xpose.msra.mxu1 %v4404_v39  ;;  %4108 = vmatprep.mubr.msk.f32.mxu1 %vm4912_vm0, %v6052_v29  ;;  %v848_v7 = vpop.permute.xlu0 %847  ;;  %v915_v39 = vmul.f32 %v723_v30, %v5494_v61  ;;  %v1111_v61 = vmul.f32 %v1105_v25, %v1099_v21  ;;  %v730_v30 = vld [vmem:[#allocation13 + $0xd8] sm:$0xff] }
 0x322   :  { %v838_v17 = vpop.permute.xlu1 %837  ;;  %4406 = vmatprep.subr.bf16.mxu1 %v6053_v19  ;;  %v951_v25 = vmul.f32 %v848_v7, %v759_v12 }
 0x323   :  { %v946_v9 = vmul.f32 %v838_v17, %v754_v41  ;;  %v5633_v10 = vadd.f32 %v947_v56, %v915_v39  ;;  %v1113_v35 = vadd.f32 %v1111_v61, %v1109_v36  ;;  %v922_v39 = vmul.f32 %v730_v30, %v5544_v24 }
 0x325   :  { %v5627_v27 = vadd.f32 %v946_v9, %v914_v37  ;;  %v1172_v14 = vrot.slane %v1113_v35, %v5556_v4 }
 0x326   :  { %v842_v20 = vpop.permute.xlu1 %841 }
 0x327   :  { %v4413_v51 = vpack.c.bf16 %v5627_v27, %v5625_v2  ;;  %v948_v48 = vmul.f32 %v842_v20, %v756_v16  ;;  %v983_v16 = vadd.f32 %v951_v25, %v919_v18  ;;  %v921_v20 = vmul.f32 %v729_v42, %v5527_v62 }
 0x328   :  { %4109 = vmatmul.mubr.f32.vlgmr.msra.gmra.mrb[14].mxu1 %v1162_v1  ;;  %v1188_v32 = vrot.slane %v1172_v14, %v5556_v4  ;;  %v1180_v24 = vcombine.high %v1172_v14, %v1172_v14  ;;  %v1165_v2 = vcombine.high %v1113_v35, %v1113_v35 }
 0x329   :  { %v5635_v13 = vadd.f32 %v948_v48, %v916_v23  ;;  %4408 = vmatpush3.bf16.xpose.msra.mxu1 %v4407_v43  ;;  %4115 = vmatprep.mubr.msk.f32.mxu1 %vm4912_vm0, %v6052_v29  ;;  %v852_v43 = vpop.permute.xlu0 %851  ;;  %v731_v23 = vld [vmem:[#allocation13 + $0xe0] sm:$0xff]  ;;  %v732_v48 = vld [vmem:[#allocation13 + $0xe8] sm:$0xff] }
 0x32a   :  { %v846_v31 = vpop.permute.xlu1 %845  ;;  %4409 = vmatprep.subr.bf16.mxu1 %v6053_v19  ;;  %v953_v56 = vmul.f32 %v852_v43, %v761_v8  ;;  %v924_v54 = vmul.f32 %v732_v48, %v5549_v3  ;;  %v1210_v3 = vcombine.high %v1188_v32, %v1188_v32  ;;  %v733_v43 = vld [vmem:[#allocation13 + $0xf0] sm:$0xff] }
 0x32b   :  { %v4416_v55 = vpack.c.bf16 %v5635_v13, %v5633_v10  ;;  %v950_v40 = vmul.f32 %v846_v31, %v758_v50  ;;  %v923_v10 = vmul.f32 %v731_v23, %v5537_v11  ;;  %v1202_v11 = vrot.slane %v1180_v24, %v5556_v4 }
 0x32c   :  { %v985_v15 = vadd.f32 %v953_v56, %v921_v20  ;;  %v925_v25 = vmul.f32 %v733_v43, %v5598_v5 }
 0x32d   :  { %v982_v41 = vadd.f32 %v950_v40, %v918_v28  ;;  %v856_v7 = vpop.permute.xlu0 %855  ;;  %v1212_v27 = vcombine.high %v1202_v11, %v1202_v11  ;;  %v766_v40 = vld [vmem:[#allocation14 + $0xf8] sm:$0xff] }
 0x32e   :  { %v850_v17 = vpop.permute.xlu1 %849 }
 0x32f   :  { %v4419_v37 = vpack.c.bf16 %v982_v41, %v981_v38  ;;  %v952_v9 = vmul.f32 %v850_v17, %v760_v34 }
 0x330   :  { %4116 = vmatmul.mubr.f32.vlgmr.msra.gmra.mrb[16].mxu1 %v1164_v45 }
 0x331   :  { %v984_v57 = vadd.f32 %v952_v9, %v920_v63  ;;  %4411 = vmatpush3.bf16.xpose.msra.mxu1 %v4410_v46  ;;  %4122 = vmatprep.mubr.msk.f32.mxu1 %vm4912_vm0, %v6052_v29  ;;  %v955_v46 = vmul.f32 %v856_v7, %v763_v59 }
 0x332   :  { %v854_v33 = vpop.permute.xlu1 %853  ;;  %4412 = vmatprep.subr.bf16.mxu1 %v6053_v19 }
 0x333   :  { %v4422_v1 = vpack.c.bf16 %v984_v57, %v983_v16  ;;  %v954_v21 = vmul.f32 %v854_v33, %v762_v52  ;;  %v987_v62 = vadd.f32 %v955_v46, %v923_v10 }
 0x335   :  { %v986_v26 = vadd.f32 %v954_v21, %v922_v39 }
 0x336   :  { %v858_v50 = vpop.permute.xlu1 %857 }
 0x337   :  { %v4425_v22 = vpack.c.bf16 %v986_v26, %v985_v15  ;;  %v956_v13 = vmul.f32 %v858_v50, %v764_v6 }
 0x338   :  { %4123 = vmatmul.mubr.f32.vlgmr.msra.gmra.mrb[18].mxu1 %v1188_v32 }
 0x339   :  { %v988_v61 = vadd.f32 %v956_v13, %v924_v54  ;;  %4414 = vmatpush3.bf16.xpose.msra.mxu1 %v4413_v51  ;;  %4129 = vmatprep.mubr.msk.f32.mxu1 %vm4912_vm0, %v6052_v29  ;;  %v1179_v51 = vrot.slane %v1165_v2, %v5556_v4 }
 0x33a   :  { %4415 = vmatprep.subr.bf16.mxu1 %v6053_v19 }
 0x33b   :  { %v4428_v12 = vpack.c.bf16 %v988_v61, %v987_v62  ;;  %v1195_v31 = vrot.slane %v1179_v51, %v5556_v4  ;;  %v1181_v44 = vcombine.high %v1179_v51, %v1179_v51 }
 0x33d   :  { %v1211_v28 = vcombine.high %v1195_v31, %v1195_v31 }
 0x340   :  { %4130 = vmatmul.mubr.f32.vlgmr.msra.gmra.mrb[20].mxu1 %v1202_v11 }
 0x341   :  { %4417 = vmatpush3.bf16.xpose.msra.mxu1 %v4416_v55  ;;  %4136 = vmatprep.mubr.msk.f32.mxu1 %vm4912_vm0, %v6052_v29  ;;  %v1209_v55 = vrot.slane %v1181_v44, %v5556_v4  ;;  %v926_v4 = vmul.f32 %v734_v0, %v5585_v58  ;;  %v6054_v58 = vpack.c.bf16 %v5175_v53, %v5163_v47 }
 0x342   :  { %4418 = vmatprep.subr.bf16.mxu1 %v6053_v19 }
 0x343   :  { %v1213_v18 = vcombine.high %v1209_v55, %v1209_v55 }
 0x348   :  { %4137 = vmatmul.mubr.f32.vlgmr.msra.gmra.mrb[22].mxu1 %v1210_v3 }
 0x349   :  { %4420 = vmatpush3.bf16.xpose.msra.mxu1 %v4419_v37  ;;  %4143 = vmatprep.mubr.msk.f32.mxu1 %vm4912_vm0, %v6052_v29 }
 0x34a   :  { %4421 = vmatprep.subr.bf16.mxu1 %v6053_v19 }
 0x350   :  { %4144 = vmatmul.mubr.f32.vlgmr.msra.gmra.mrb[24].mxu1 %v1212_v27 }
 0x351   :  { %4423 = vmatpush3.bf16.xpose.msra.mxu1 %v4422_v1  ;;  %4150 = vmatprep.mubr.msk.f32.mxu1 %vm4912_vm0, %v6052_v29 }
 0x352   :  { %4424 = vmatprep.subr.bf16.mxu1 %v6053_v19 }
 0x358   :  { %4151 = vmatmul.mubr.f32.vlgmr.msra.gmra.mrb[26].mxu1 %v1195_v31 }
 0x359   :  { %4426 = vmatpush3.bf16.xpose.msra.mxu1 %v4425_v22  ;;  %4157 = vmatprep.mubr.msk.f32.mxu1 %vm4912_vm0, %v6052_v29 }
 0x35a   :  { %4427 = vmatprep.subr.bf16.mxu1 %v6053_v19 }
 0x360   :  { %4158 = vmatmul.mubr.f32.vlgmr.msra.gmra.mrb[28].mxu1 %v1209_v55 }
 0x361   :  { %4429 = vmatpush3.bf16.xpose.msra.mxu1 %v4428_v12  ;;  %4164 = vmatprep.mubr.msk.f32.mxu1 %vm4912_vm0, %v6052_v29 }
 0x362   :  { %4430 = vmatprep.subr.bf16.mxu1 %v6053_v19 }
 0x368   :  { %4165 = vmatmul.mubr.f32.vlgmr.msra.gmra.mrb[30].mxu1 %v1211_v28 }
 0x369   :  { %4171 = vmatprep.mubr.msk.f32.mxu1 %vm4912_vm0, %v6052_v29 }
 0x381   :  { %v862_v36 = vpop.permute.xlu1 %861 }
 0x382   :  { %v958_v34 = vmul.f32 %v862_v36, %v766_v40 }
 0x384   :  { %v990_v35 = vadd.f32 %v958_v34, %v926_v4 }
 0x38a   :  { %v860_v38 = vpop.permute.xlu0 %859 }
 0x38b   :  { %v957_v41 = vmul.f32 %v860_v38, %v765_v49 }
 0x38d   :  { %v989_v8 = vadd.f32 %v957_v41, %v925_v25 }
 0x38f   :  { %v4431_v17 = vpack.c.bf16 %v990_v35, %v989_v8 }
 0x391   :  { %4432 = vmatpush3.bf16.xpose.msra.mxu1 %v4431_v17 }
 0x392   :  { %4433 = vmatprep.subr.bf16.mxu1 %v6053_v19 }
 0x394   :  { %v1296_v45 = vpop.f32.mrb[2].mxu1 }
 0x395   :  { %v5691_v37 = vmul.f32 0.088388346, %v1296_v45  ;;  %v4068_v63 = vpop.f32.mrb[3].mxu1 }
 0x397   :  { %v2367_v9 = vsel %vm2366_vm1, %v5691_v37, -inf }
 0x398   :  { %4172 = vmatmul.mubr.f32.vlgmr.msra.gmra.mrb[32].mxu1 %v1213_v18  ;;  %2368 = vmax.xlane.f32.xlu0 %v2367_v9 }
 0x399   :  { %4435 = vmatpush3.bf16.msra.mxu1 %v6054_v58  ;;  %4178 = vmatprep.mubr.msk.f32.mxu1 %vm4912_vm0, %v6052_v29 }
 0x39a   :  { %4436 = vmatprep.subr.bf16.mxu1 %v6053_v19 }
 0x39c   :  { %v1366_v5 = vpop.f32.mrb[4].mxu1 }
 0x39d   :  { %v5701_v42 = vmul.f32 0.088388346, %v1366_v5  ;;  %v4075_v30 = vpop.f32.mrb[5].mxu1 }
 0x39f   :  { %v2370_v52 = vsel %vm2366_vm1, %v5701_v42, -inf }
 0x3a0   :  { %2371 = vmax.xlane.f32.xlu1 %v2370_v52 }
 0x3a4   :  { %v1436_v16 = vpop.f32.mrb[6].mxu1 }
 0x3a5   :  { %v5705_v56 = vmul.f32 0.088388346, %v1436_v16  ;;  %v4082_v57 = vpop.f32.mrb[7].mxu1 }
 0x3a7   :  { %v2373_v47 = vsel %vm2366_vm1, %v5705_v56, -inf }
 0x3a8   :  { %2374 = vmax.xlane.f32.xlu0 %v2373_v47 }
 0x3ac   :  { %v1506_v53 = vpop.f32.mrb[8].mxu1 }
 0x3ad   :  { %v5709_v14 = vmul.f32 0.088388346, %v1506_v53  ;;  %v4089_v59 = vpop.f32.mrb[9].mxu1 }
 0x3af   :  { %v2376_v7 = vsel %vm2366_vm1, %v5709_v14, -inf }
 0x3b0   :  { %2377 = vmax.xlane.f32.xlu0 %v2376_v7 }
 0x3eb   :  { %v1576_v33 = vpop.f32.mrb[10].mxu1 }
 0x3ec   :  { %v5713_v20 = vmul.f32 0.088388346, %v1576_v33  ;;  %v4096_v1 = vpop.f32.mrb[11].mxu1 }
 0x3ee   :  { %v2379_v39 = vsel %vm2366_vm1, %v5713_v20, -inf }
 0x3ef   :  { %2380 = vmax.xlane.f32.xlu0 %v2379_v39 }
 0x3f3   :  { %v1646_v21 = vpop.f32.mrb[12].mxu1 }
 0x3f4   :  { %v5717_v23 = vmul.f32 0.088388346, %v1646_v21  ;;  %v4103_v48 = vpop.f32.mrb[13].mxu1 }
 0x3f6   :  { %v2382_v6 = vsel %vm2366_vm1, %v5717_v23, -inf }
 0x3f7   :  { %2383 = vmax.xlane.f32.xlu1 %v2382_v6 }
 0x3fb   :  { %v1716_v15 = vpop.f32.mrb[14].mxu1 }
 0x3fc   :  { %v5721_v46 = vmul.f32 0.088388346, %v1716_v15  ;;  %v4110_v26 = vpop.f32.mrb[15].mxu1 }
 0x3fe   :  { %v2385_v32 = vsel %vm2366_vm1, %v5721_v46, -inf }
 0x3ff   :  { %2386 = vmax.xlane.f32.xlu0 %v2385_v32 }
 0x403   :  { %v1786_v50 = vpop.f32.mrb[16].mxu1 }
 0x404   :  { %v5725_v10 = vmul.f32 0.088388346, %v1786_v50  ;;  %v4117_v22 = vpop.f32.mrb[17].mxu1 }
 0x406   :  { %v2388_v54 = vsel %vm2366_vm1, %v5725_v10, -inf }
 0x407   :  { %2389 = vmax.xlane.f32.xlu1 %v2388_v54 }
 0x40b   :  { %v1856_v13 = vpop.f32.mrb[18].mxu1 }
 0x40c   :  { %v5729_v62 = vmul.f32 0.088388346, %v1856_v13  ;;  %v4124_v61 = vpop.f32.mrb[19].mxu1 }
 0x40e   :  { %v2391_v24 = vsel %vm2366_vm1, %v5729_v62, -inf }
 0x40f   :  { %2392 = vmax.xlane.f32.xlu0 %v2391_v24 }
 0x413   :  { %v1926_v12 = vpop.f32.mrb[20].mxu1 }
 0x414   :  { %v5733_v11 = vmul.f32 0.088388346, %v1926_v12  ;;  %v4131_v3 = vpop.f32.mrb[21].mxu1 }
 0x416   :  { %v2394_v2 = vsel %vm2366_vm1, %v5733_v11, -inf }
 0x417   :  { %2395 = vmax.xlane.f32.xlu1 %v2394_v2 }
 0x41b   :  { %v1996_v27 = vpop.f32.mrb[22].mxu1 }
 0x41c   :  { %v5737_v51 = vmul.f32 0.088388346, %v1996_v27  ;;  %v4138_v31 = vpop.f32.mrb[23].mxu1 }
 0x41e   :  { %v2397_v44 = vsel %vm2366_vm1, %v5737_v51, -inf }
 0x41f   :  { %2398 = vmax.xlane.f32.xlu0 %v2397_v44 }
 0x423   :  { %v2066_v55 = vpop.f32.mrb[24].mxu1 }
 0x424   :  { %v5741_v28 = vmul.f32 0.088388346, %v2066_v55  ;;  %v4145_v40 = vpop.f32.mrb[25].mxu1 }
 0x425   :  { %v2369_v0 = vpop.xlane.xlu0 %2368 }
 0x426   :  { %v2400_v36 = vsel %vm2366_vm1, %v5741_v28, -inf  ;;  %v2415_v38 = vsub.f32 %v5691_v37, %v2369_v0 }
 0x427   :  { %2401 = vmax.xlane.f32.xlu1 %v2400_v36 }
 0x428   :  { %v2431_v25 = vmul.f32 1.442695, %v2415_v38 }
 0x42a   :  { %4600 = vpow2.f32 %v2431_v25 }
 0x42b   :  { %v2136_v43 = vpop.f32.mrb[26].mxu1 }
 0x42c   :  { %v5745_v49 = vmul.f32 0.088388346, %v2136_v43  ;;  %v4152_v34 = vpop.f32.mrb[27].mxu1 }
 0x42d   :  { %v2372_v57 = vpop.xlane.xlu1 %2371 }
 0x42e   :  { %v2403_v4 = vsel %vm2366_vm1, %v5745_v49, -inf  ;;  %v2416_v47 = vsub.f32 %v5701_v42, %v2372_v57 }
 0x42f   :  { %2404 = vmax.xlane.f32.xlu0 %v2403_v4 }
 0x430   :  { %v2433_v59 = vmul.f32 1.442695, %v2416_v47 }
 0x433   :  { %v2206_v41 = vpop.f32.mrb[28].mxu1 }
 0x434   :  { %v5750_v35 = vmul.f32 0.088388346, %v2206_v41  ;;  %v4159_v8 = vpop.f32.mrb[29].mxu1  ;;  %v5759_v30 = vpop.eup %4600 }
 0x435   :  { %v2375_v45 = vpop.xlane.xlu0 %2374  ;;  %v2463_v52 = vsel %vm2366_vm1, %v5759_v30, 0.0 }
 0x436   :  { %v2406_v17 = vsel %vm2366_vm1, %v5750_v35, -inf  ;;  %v2417_v18 = vsub.f32 %v5705_v56, %v2375_v45 }
 0x437   :  { %2407 = vmax.xlane.f32.xlu1 %v2406_v17 }
 0x438   :  { %v2435_v63 = vmul.f32 1.442695, %v2417_v18 }
 0x43a   :  { %4602 = vpow2.f32 %v2435_v63 }
 0x43b   :  { %v2276_v9 = vpop.f32.mrb[30].mxu1  ;;  %4604 = vpow2.f32 %v2433_v59 }
 0x43c   :  { %v5755_v37 = vmul.f32 0.088388346, %v2276_v9  ;;  %v4166_v58 = vpop.f32.mrb[31].mxu1 }
 0x43d   :  { %v2378_v53 = vpop.xlane.xlu0 %2377 }
 0x43e   :  { %v2409_v5 = vsel %vm2366_vm1, %v5755_v37, -inf  ;;  %v2418_v7 = vsub.f32 %v5709_v14, %v2378_v53 }
 0x43f   :  { %2410 = vmax.xlane.f32.xlu0 %v2409_v5 }
 0x440   :  { %v2437_v33 = vmul.f32 1.442695, %v2418_v7 }
 0x442   :  { %4606 = vpow2.f32 %v2437_v33 }
 0x443   :  { %2464 = vadd.xlane.f32.xlu0 %v2463_v52 }
 0x444   :  { %v5763_v16 = vpop.eup %4602 }
 0x445   :  { %v2469_v56 = vsel %vm2366_vm1, %v5763_v16, 0.0  ;;  %v5773_v6 = vpop.eup %4604 }
 0x446   :  { %v2466_v42 = vsel %vm2366_vm1, %v5773_v6, 0.0 }
 0x447   :  { %2470 = vadd.xlane.f32.xlu0 %v2469_v56 }
 0x44c   :  { %v5777_v15 = vpop.eup %4606 }
 0x44d   :  { %v2472_v14 = vsel %vm2366_vm1, %v5777_v15, 0.0 }
 0x46b   :  { %v2346_v1 = vpop.f32.mrb[32].mxu1 }
 0x46c   :  { %v5769_v39 = vmul.f32 0.088388346, %v2346_v1  ;;  %v4173_v21 = vpop.f32.mrb[33].mxu1 }
 0x46e   :  { %v2412_v48 = vsel %vm2366_vm1, %v5769_v39, -inf }
 0x46f   :  { %2413 = vmax.xlane.f32.xlu1 %v2412_v48 }
 0x473   :  { %2467 = vadd.xlane.f32.xlu1 %v2466_v42 }
 0x477   :  { %2473 = vadd.xlane.f32.xlu1 %v2472_v14 }
 0x47c   :  { %v2381_v26 = vpop.xlane.xlu0 %2380 }
 0x47d   :  { %v2419_v32 = vsub.f32 %v5713_v20, %v2381_v26 }
 0x47f   :  { %v2439_v50 = vmul.f32 1.442695, %v2419_v32 }
 0x481   :  { %4608 = vpow2.f32 %v2439_v50  ;;  %v6055_v50 = vld [vmem:[#allocation24_spill] sm:$0xff] }
 0x484   :  { %v2384_v22 = vpop.xlane.xlu1 %2383 }
 0x485   :  { %v2420_v54 = vsub.f32 %v5717_v23, %v2384_v22  ;;  %v6056_v22 = vpack.c.bf16 %v5189_v60, %v6055_v50 }
 0x487   :  { %v2441_v13 = vmul.f32 1.442695, %v2420_v54 }
 0x489   :  { %4610 = vpow2.f32 %v2441_v13 }
 0x48b   :  { %v5783_v61 = vpop.eup %4608 }
 0x48c   :  { %v2387_v24 = vpop.xlane.xlu0 %2386  ;;  %v2475_v12 = vsel %vm2366_vm1, %v5783_v61, 0.0 }
 0x48d   :  { %v2421_v3 = vsub.f32 %v5721_v46, %v2387_v24  ;;  %2476 = vadd.xlane.f32.xlu0 %v2475_v12 }
 0x48f   :  { %v2443_v2 = vmul.f32 1.442695, %v2421_v3 }
 0x491   :  { %4612 = vpow2.f32 %v2443_v2 }
 0x493   :  { %v5788_v27 = vpop.eup %4610 }
 0x494   :  { %v2390_v20 = vpop.xlane.xlu1 %2389  ;;  %v2478_v31 = vsel %vm2366_vm1, %v5788_v27, 0.0 }
 0x495   :  { %v2422_v23 = vsub.f32 %v5725_v10, %v2390_v20  ;;  %2479 = vadd.xlane.f32.xlu1 %v2478_v31 }
 0x497   :  { %v2445_v44 = vmul.f32 1.442695, %v2422_v23 }
 0x499   :  { %4614 = vpow2.f32 %v2445_v44  ;;  %v6058_v44 = vld [vmem:[#allocation25_spill] sm:$0xff] }
 0x49b   :  { %v5793_v55 = vpop.eup %4612 }
 0x49c   :  { %v2393_v40 = vpop.xlane.xlu0 %2392  ;;  %v2481_v46 = vsel %vm2366_vm1, %v5793_v55, 0.0 }
 0x49d   :  { %v2423_v36 = vsub.f32 %v5729_v62, %v2393_v40  ;;  %2482 = vadd.xlane.f32.xlu0 %v2481_v46 }
 0x49f   :  { %v2447_v0 = vmul.f32 1.442695, %v2423_v36 }
 0x4a1   :  { %4616 = vpow2.f32 %v2447_v0  ;;  %v6060_v0 = vld [vmem:[#allocation28_spill] sm:$0xff] }
 0x4a3   :  { %v5798_v43 = vpop.eup %4614 }
 0x4a4   :  { %v2396_v34 = vpop.xlane.xlu1 %2395  ;;  %v2484_v10 = vsel %vm2366_vm1, %v5798_v43, 0.0 }
 0x4a5   :  { %v2424_v38 = vsub.f32 %v5733_v11, %v2396_v34  ;;  %2485 = vadd.xlane.f32.xlu1 %v2484_v10 }
 0x4a7   :  { %v2449_v4 = vmul.f32 1.442695, %v2424_v38  ;;  %v6063_v38 = vld [vmem:[#allocation30_spill] sm:$0xff] }
 0x4a9   :  { %4618 = vpow2.f32 %v2449_v4 }
 0x4ab   :  { %v5803_v25 = vpop.eup %4616 }
 0x4ac   :  { %v2399_v41 = vpop.xlane.xlu0 %2398  ;;  %v2487_v62 = vsel %vm2366_vm1, %v5803_v25, 0.0 }
 0x4ad   :  { %v2425_v8 = vsub.f32 %v5737_v51, %v2399_v41  ;;  %2488 = vadd.xlane.f32.xlu0 %v2487_v62 }
 0x4af   :  { %v2451_v17 = vmul.f32 1.442695, %v2425_v8 }
 0x4b1   :  { %4620 = vpow2.f32 %v2451_v17  ;;  %v6066_v17 = vld [vmem:[#allocation32_spill] sm:$0xff] }
 0x4b3   :  { %v5808_v45 = vpop.eup %4618 }
 0x4b4   :  { %v2402_v18 = vpop.xlane.xlu1 %2401  ;;  %v2490_v11 = vsel %vm2366_vm1, %v5808_v45, 0.0 }
 0x4b5   :  { %v2426_v63 = vsub.f32 %v5741_v28, %v2402_v18  ;;  %2491 = vadd.xlane.f32.xlu1 %v2490_v11  ;;  %v6067_v18 = vld [vmem:[#allocation31_spill] sm:$0xff] }
 0x4b6   :  { %v6068_v11 = vpack.c.bf16 %v6066_v17, %v6067_v18 }
 0x4b7   :  { %v2453_v9 = vmul.f32 1.442695, %v2426_v63 }
 0x4b9   :  { %4622 = vpow2.f32 %v2453_v9 }
 0x4bb   :  { %v5813_v58 = vpop.eup %4620 }
 0x4bc   :  { %v2405_v5 = vpop.xlane.xlu0 %2404  ;;  %v2493_v51 = vsel %vm2366_vm1, %v5813_v58, 0.0 }
 0x4bd   :  { %v2427_v52 = vsub.f32 %v5745_v49, %v2405_v5  ;;  %2494 = vadd.xlane.f32.xlu0 %v2493_v51  ;;  %v6069_v51 = vld [vmem:[#allocation34_spill] sm:$0xff] }
 0x4bf   :  { %v2455_v56 = vmul.f32 1.442695, %v2427_v52 }
 0x4c1   :  { %4624 = vpow2.f32 %v2455_v56 }
 0x4c3   :  { %v5818_v57 = vpop.eup %4622 }
 0x4c4   :  { %v2408_v47 = vpop.xlane.xlu1 %2407  ;;  %v2496_v28 = vsel %vm2366_vm1, %v5818_v57, 0.0 }
 0x4c5   :  { %v2428_v53 = vsub.f32 %v5750_v35, %v2408_v47  ;;  %2497 = vadd.xlane.f32.xlu1 %v2496_v28 }
 0x4c7   :  { %v2457_v59 = vmul.f32 1.442695, %v2428_v53  ;;  %v6072_v53 = vld [vmem:[#allocation36_spill] sm:$0xff] }
 0x4c9   :  { %4626 = vpow2.f32 %v2457_v59 }
 0x4cb   :  { %v5823_v7 = vpop.eup %4624 }
 0x4cc   :  { %v2411_v33 = vpop.xlane.xlu0 %2410  ;;  %v2499_v49 = vsel %vm2366_vm1, %v5823_v7, 0.0 }
 0x4cd   :  { %v2429_v1 = vsub.f32 %v5755_v37, %v2411_v33  ;;  %2500 = vadd.xlane.f32.xlu0 %v2499_v49 }
 0x4cf   :  { %v2459_v21 = vmul.f32 1.442695, %v2429_v1 }
 0x4d0   :  { %v2465_v48 = vpop.xlane.xlu0 %2464 }
 0x4d1   :  { %4628 = vpow2.f32 %v2459_v21  ;;  %v6075_v21 = vld [vmem:[#allocation38_spill] sm:$0xff] }
 0x4d2   :  { %4630 = vrcp.f32 %v2465_v48 }
 0x4d3   :  { %v5828_v42 = vpop.eup %4626 }
 0x4d4   :  { %v2502_v35 = vsel %vm2366_vm1, %v5828_v42, 0.0  ;;  %v2471_v3 = vpop.xlane.xlu0 %2470 }
 0x4d5   :  { %2503 = vadd.xlane.f32.xlu1 %v2502_v35 }
 0x4db   :  { %v5832_v14 = vpop.eup %4628 }
 0x4dc   :  { %v4631_v26 = vpop.eup %4630  ;;  %v2505_v32 = vsel %vm2366_vm1, %v5832_v14, 0.0 }
 0x4dd   :  { %v2512_v37 = vmul.f32 %v4631_v26, %v5759_v30  ;;  %2506 = vadd.xlane.f32.xlu0 %v2505_v32 }
 0x4df   :  { %4179 = vmatmul.mubr.msk.f32.vlgmr.msra.gmra.mrb[34].mxu1 %vm2543_vm2, %v2512_v37  ;;  %v6078_v37 = vld [vmem:[#allocation40_spill] sm:$0xff] }
 0x4e0   :  { %4438 = vmatpush3.bf16.msra.mxu1 %v6056_v22  ;;  %4185 = vmatprep.mubr.msk.f32.mxu1 %vm4912_vm0, %v6052_v29 }
 0x4e1   :  { %4439 = vmatprep.subr.bf16.mxu1 %v6053_v19 }
 0x4fc   :  { %v2414_v54 = vpop.xlane.xlu1 %2413 }
 0x4fd   :  { %v2430_v13 = vsub.f32 %v5769_v39, %v2414_v54  ;;  %v6057_v39 = vld [vmem:[#allocation26_spill] sm:$0xff] }
 0x4fe   :  { %v6059_v40 = vpack.c.bf16 %v6057_v39, %v6058_v44 }
 0x4ff   :  { %v2461_v24 = vmul.f32 1.442695, %v2430_v13 }
 0x500   :  { %v2468_v12 = vpop.xlane.xlu1 %2467 }
 0x501   :  { %4632 = vpow2.f32 %v2461_v24  ;;  %v6081_v24 = vld [vmem:[#allocation42_spill] sm:$0xff] }
 0x502   :  { %4634 = vrcp.f32 %v2468_v12 }
 0x503   :  { %4636 = vrcp.f32 %v2471_v3 }
 0x504   :  { %v2474_v30 = vpop.xlane.xlu1 %2473 }
 0x505   :  { %4638 = vrcp.f32 %v2474_v30 }
 0x50b   :  { %v5845_v2 = vpop.eup %4632 }
 0x50c   :  { %v4635_v60 = vpop.eup %4634  ;;  %v2508_v20 = vsel %vm2366_vm1, %v5845_v2, 0.0 }
 0x50d   :  { %v2514_v31 = vmul.f32 %v4635_v60, %v5773_v6  ;;  %2509 = vadd.xlane.f32.xlu1 %v2508_v20  ;;  %v4637_v23 = vpop.eup %4636  ;;  %v6061_v6 = vld [vmem:[#allocation27_spill] sm:$0xff]  ;;  %v6084_v20 = vld [vmem:[#allocation44_spill] sm:$0xff] }
 0x50e   :  { %v2516_v46 = vmul.f32 %v4637_v23, %v5763_v16  ;;  %v6062_v34 = vpack.c.bf16 %v6060_v0, %v6061_v6  ;;  %v6064_v16 = vld [vmem:[#allocation29_spill] sm:$0xff] }
 0x50f   :  { %4186 = vmatmul.mubr.msk.f32.vlgmr.msra.gmra.mrb[36].mxu1 %vm2543_vm2, %v2514_v31  ;;  %v4639_v36 = vpop.eup %4638  ;;  %v6065_v4 = vpack.c.bf16 %v6063_v38, %v6064_v16 }
 0x510   :  { %4441 = vmatpush3.bf16.msra.mxu1 %v6059_v40  ;;  %4192 = vmatprep.mubr.msk.f32.mxu1 %vm4912_vm0, %v6052_v29  ;;  %v2518_v10 = vmul.f32 %v4639_v36, %v5777_v15  ;;  %v6087_v40 = vld [vmem:[#allocation46_spill] sm:$0xff] }
 0x511   :  { %4442 = vmatprep.subr.bf16.mxu1 %v6053_v19 }
 0x513   :  { %4193 = vmatmul.mubr.msk.f32.vlgmr.msra.gmra.mrb[38].mxu1 %vm2543_vm2, %v2516_v46 }
 0x514   :  { %4444 = vmatpush3.bf16.msra.mxu1 %v6062_v34  ;;  %4199 = vmatprep.mubr.msk.f32.mxu1 %vm4912_vm0, %v6052_v29  ;;  %v6090_v34 = vld [vmem:[#allocation48_spill] sm:$0xff] }
 0x515   :  { %4445 = vmatprep.subr.bf16.mxu1 %v6053_v19 }
 0x517   :  { %4200 = vmatmul.mubr.msk.f32.vlgmr.msra.gmra.mrb[40].mxu1 %vm2543_vm2, %v2518_v10 }
 0x518   :  { %4447 = vmatpush3.bf16.msra.mxu1 %v6065_v4  ;;  %4206 = vmatprep.mubr.msk.f32.mxu1 %vm4912_vm0, %v6052_v29 }
 0x519   :  { %4448 = vmatprep.subr.bf16.mxu1 %v6053_v19 }
 0x51a   :  { %v2477_v41 = vpop.xlane.xlu0 %2476 }
 0x51b   :  { %4640 = vrcp.f32 %v2477_v41  ;;  %v6094_v41 = vld [vmem:[#allocation49_spill] sm:$0xff] }
 0x522   :  { %v2480_v62 = vpop.xlane.xlu1 %2479 }
 0x523   :  { %4642 = vrcp.f32 %v2480_v62 }
 0x525   :  { %v4641_v8 = vpop.eup %4640 }
 0x526   :  { %v2520_v15 = vmul.f32 %v4641_v8, %v5783_v61  ;;  %v6070_v61 = vld [vmem:[#allocation33_spill] sm:$0xff] }
 0x527   :  { %v6071_v52 = vpack.c.bf16 %v6069_v51, %v6070_v61  ;;  %v3715_v61 = vld [vmem:[#allocation16 + $0x18] sm:$0xff] }
 0x528   :  { %4207 = vmatmul.mubr.msk.f32.vlgmr.msra.gmra.mrb[42].mxu1 %vm2543_vm2, %v2520_v15 }
 0x529   :  { %4450 = vmatpush3.bf16.msra.mxu1 %v6068_v11  ;;  %4213 = vmatprep.mubr.msk.f32.mxu1 %vm4912_vm0, %v6052_v29 }
 0x52a   :  { %v2483_v63 = vpop.xlane.xlu0 %2482  ;;  %4454 = vmatprep.subr.bf16.mxu1 %v6053_v19 }
 0x52b   :  { %4644 = vrcp.f32 %v2483_v63  ;;  %v3712_v63 = vld [vmem:[#allocation16] sm:$0xff] }
 0x52d   :  { %v4643_v9 = vpop.eup %4642 }
 0x52e   :  { %v2522_v5 = vmul.f32 %v4643_v9, %v5788_v27  ;;  %v6073_v27 = vld [vmem:[#allocation35_spill] sm:$0xff] }
 0x52f   :  { %v6074_v59 = vpack.c.bf16 %v6072_v53, %v6073_v27  ;;  %v3713_v9 = vld [vmem:[#allocation16 + $0x8] sm:$0xff]  ;;  %v3720_v53 = vld [vmem:[#allocation16 + $0x40] sm:$0xff] }
 0x530   :  { %4214 = vmatmul.mubr.msk.f32.vlgmr.msra.gmra.mrb[44].mxu1 %vm2543_vm2, %v2522_v5  ;;  %v3714_v5 = vld [vmem:[#allocation16 + $0x10] sm:$0xff]  ;;  %v4481_v51 = vpack.c.bf16 %v3713_v9, %v3712_v63  ;;  %v3721_v27 = vld [vmem:[#allocation16 + $0x48] sm:$0xff] }
 0x531   :  { %4456 = vmatpush3.bf16.msra.mxu1 %v6071_v52  ;;  %4227 = vmatprep.mubr.msk.f32.mxu1 %vm4912_vm0, %v6052_v29  ;;  %v3716_v52 = vld [vmem:[#allocation16 + $0x20] sm:$0xff] }
 0x532   :  { %v2486_v56 = vpop.xlane.xlu1 %2485  ;;  %4460 = vmatprep.subr.bf16.mxu1 %v6053_v19 }
 0x533   :  { %4646 = vrcp.f32 %v2486_v56  ;;  %v3717_v56 = vld [vmem:[#allocation16 + $0x28] sm:$0xff] }
 0x535   :  { %v4645_v47 = vpop.eup %4644 }
 0x536   :  { %v2524_v28 = vmul.f32 %v4645_v47, %v5793_v55  ;;  %v6076_v55 = vld [vmem:[#allocation37_spill] sm:$0xff]  ;;  %v3718_v47 = vld [vmem:[#allocation16 + $0x30] sm:$0xff] }
 0x537   :  { %v6077_v48 = vpack.c.bf16 %v6075_v21, %v6076_v55  ;;  %v3724_v21 = vld [vmem:[#allocation16 + $0x60] sm:$0xff]  ;;  %v3725_v55 = vld [vmem:[#allocation16 + $0x68] sm:$0xff] }
 0x538   :  { %4221 = vmatmul.mubr.msk.f32.vlgmr.msra.gmra.mrb[64].mxu0 %vm2543_vm2, %v2524_v28  ;;  %v3719_v28 = vld [vmem:[#allocation16 + $0x38] sm:$0xff] }
 0x539   :  { %4459 = vmatpush3.bf16.msra.mxu0 %v6074_v59  ;;  %4234 = vmatprep.mubr.msk.f32.mxu0 %vm4912_vm0, %v6052_v29  ;;  %v4497_v59 = vpack.c.bf16 %v3721_v27, %v3720_v53 }
 0x53a   :  { %v2489_v33 = vpop.xlane.xlu0 %2488  ;;  %4463 = vmatprep.subr.bf16.mxu0 %v6053_v19 }
 0x53b   :  { %4648 = vrcp.f32 %v2489_v33  ;;  %v3722_v33 = vld [vmem:[#allocation16 + $0x50] sm:$0xff] }
 0x53d   :  { %v4647_v49 = vpop.eup %4646 }
 0x53e   :  { %v2526_v1 = vmul.f32 %v4647_v49, %v5798_v43  ;;  %v6079_v43 = vld [vmem:[#allocation39_spill] sm:$0xff]  ;;  %v3723_v49 = vld [vmem:[#allocation16 + $0x58] sm:$0xff] }
 0x53f   :  { %v6080_v50 = vpack.c.bf16 %v6078_v37, %v6079_v43 }
 0x540   :  { %4228 = vmatmul.mubr.msk.f32.vlgmr.msra.gmra.mrb[46].mxu1 %vm2543_vm2, %v2526_v1  ;;  %v4501_v1 = vpack.c.bf16 %v3723_v49, %v3722_v33 }
 0x541   :  { %4462 = vmatpush3.bf16.msra.mxu1 %v6077_v48  ;;  %4241 = vmatprep.mubr.msk.f32.mxu1 %vm4912_vm0, %v6052_v29 }
 0x542   :  { %v2492_v35 = vpop.xlane.xlu1 %2491  ;;  %4466 = vmatprep.subr.bf16.mxu1 %v6053_v19 }
 0x543   :  { %4650 = vrcp.f32 %v2492_v35 }
 0x545   :  { %v4649_v26 = vpop.eup %4648 }
 0x546   :  { %v2528_v32 = vmul.f32 %v4649_v26, %v5803_v25  ;;  %v6082_v25 = vld [vmem:[#allocation41_spill] sm:$0xff] }
 0x547   :  { %v6083_v12 = vpack.c.bf16 %v6081_v24, %v6082_v25 }
 0x548   :  { %4235 = vmatmul.mubr.msk.f32.vlgmr.msra.gmra.mrb[66].mxu0 %vm2543_vm2, %v2528_v32  ;;  %v4505_v32 = vpack.c.bf16 %v3725_v55, %v3724_v21 }
 0x549   :  { %4465 = vmatpush3.bf16.msra.mxu0 %v6080_v50  ;;  %4248 = vmatprep.mubr.msk.f32.mxu0 %vm4912_vm0, %v6052_v29 }
 0x54a   :  { %v2495_v22 = vpop.xlane.xlu0 %2494  ;;  %4469 = vmatprep.subr.bf16.mxu0 %v6053_v19 }
 0x54b   :  { %4652 = vrcp.f32 %v2495_v22 }
 0x54d   :  { %v4651_v54 = vpop.eup %4650 }
 0x54e   :  { %v2530_v13 = vmul.f32 %v4651_v54, %v5808_v45  ;;  %v6085_v45 = vld [vmem:[#allocation43_spill] sm:$0xff] }
 0x54f   :  { %v6086_v31 = vpack.c.bf16 %v6084_v20, %v6085_v45 }
 0x550   :  { %4242 = vmatmul.mubr.msk.f32.vlgmr.msra.gmra.mrb[48].mxu1 %vm2543_vm2, %v2530_v13 }
 0x551   :  { %4468 = vmatpush3.bf16.msra.mxu1 %v6083_v12  ;;  %4255 = vmatprep.mubr.msk.f32.mxu1 %vm4912_vm0, %v6052_v29 }
 0x552   :  { %v2498_v3 = vpop.xlane.xlu1 %2497  ;;  %4472 = vmatprep.subr.bf16.mxu1 %v6053_v19 }
 0x553   :  { %4654 = vrcp.f32 %v2498_v3  ;;  %v3726_v3 = vld [vmem:[#allocation16 + $0x70] sm:$0xff] }
 0x555   :  { %v4653_v30 = vpop.eup %4652 }
 0x556   :  { %v2532_v60 = vmul.f32 %v4653_v30, %v5813_v58  ;;  %v6088_v58 = vld [vmem:[#allocation45_spill] sm:$0xff] }
 0x557   :  { %v6089_v46 = vpack.c.bf16 %v6087_v40, %v6088_v58  ;;  %v3727_v30 = vld [vmem:[#allocation16 + $0x78] sm:$0xff] }
 0x558   :  { %4249 = vmatmul.mubr.msk.f32.vlgmr.msra.gmra.mrb[68].mxu0 %vm2543_vm2, %v2532_v60  ;;  %v4509_v20 = vpack.c.bf16 %v3727_v30, %v3726_v3 }
 0x559   :  { %4471 = vmatpush3.bf16.msra.mxu0 %v6086_v31  ;;  %4262 = vmatprep.mubr.msk.f32.mxu0 %vm4912_vm0, %v6052_v29 }
 0x55a   :  { %v2501_v23 = vpop.xlane.xlu0 %2500  ;;  %4475 = vmatprep.subr.bf16.mxu0 %v6053_v19 }
 0x55b   :  { %4656 = vrcp.f32 %v2501_v23 }
 0x55d   :  { %v4655_v39 = vpop.eup %4654 }
 0x55e   :  { %v2534_v44 = vmul.f32 %v4655_v39, %v5818_v57  ;;  %v6091_v57 = vld [vmem:[#allocation47_spill] sm:$0xff] }
 0x55f   :  { %v6092_v10 = vpack.c.bf16 %v6090_v34, %v6091_v57 }
 0x560   :  { %4256 = vmatmul.mubr.msk.f32.vlgmr.msra.gmra.mrb[50].mxu1 %vm2543_vm2, %v2534_v44 }
 0x561   :  { %4474 = vmatpush3.bf16.msra.mxu1 %v6089_v46  ;;  %4269 = vmatprep.mubr.msk.f32.mxu1 %vm4912_vm0, %v6052_v29 }
 0x562   :  { %v2504_v36 = vpop.xlane.xlu1 %2503  ;;  %4478 = vmatprep.subr.bf16.mxu1 %v6053_v19  ;;  %v6093_v19 = vld [vmem:[#allocation50_spill] sm:$0xff] }
 0x563   :  { %4658 = vrcp.f32 %v2504_v36  ;;  %v6095_v62 = vpack.c.bf16 %v6093_v19, %v6094_v41 }
 0x565   :  { %v4657_v0 = vpop.eup %4656 }
 0x566   :  { %v2536_v6 = vmul.f32 %v4657_v0, %v5823_v7 }
 0x568   :  { %4263 = vmatmul.mubr.msk.f32.vlgmr.msra.gmra.mrb[70].mxu0 %vm2543_vm2, %v2536_v6 }
 0x569   :  { %4477 = vmatpush3.bf16.msra.mxu0 %v6092_v10  ;;  %4276 = vmatprep.mubr.msk.f32.mxu0 %vm4912_vm0, %v6052_v29 }
 0x56a   :  { %v2507_v38 = vpop.xlane.xlu0 %2506  ;;  %4482 = vmatprep.subr.bf16.mxu0 %v4481_v51 }
 0x56b   :  { %4660 = vrcp.f32 %v2507_v38 }
 0x56d   :  { %v4659_v16 = vpop.eup %4658 }
 0x56e   :  { %v2538_v4 = vmul.f32 %v4659_v16, %v5828_v42 }
 0x570   :  { %4270 = vmatmul.mubr.msk.f32.vlgmr.msra.gmra.mrb[52].mxu1 %vm2543_vm2, %v2538_v4 }
 0x571   :  { %4480 = vmatpush3.bf16.msra.mxu1 %v6095_v62  ;;  %4283 = vmatprep.mubr.msk.f32.mxu1 %vm4912_vm0, %v6052_v29  ;;  %v4485_v29 = vpack.c.bf16 %v3715_v61, %v3714_v5 }
 0x575   :  { %v4661_v7 = vpop.eup %4660 }
 0x576   :  { %v2540_v8 = vmul.f32 %v4661_v7, %v5832_v14  ;;  %v4489_v14 = vpack.c.bf16 %v3717_v56, %v3716_v52 }
 0x578   :  { %4277 = vmatmul.mubr.msk.f32.vlgmr.msra.gmra.mrb[72].mxu0 %vm2543_vm2, %v2540_v8 }
 0x579   :  { %4484 = vmatpush3.bf16.msra.mxu0 %v4481_v51 }
 0x57a   :  { %4486 = vmatprep.subr.bf16.mxu0 %v4485_v29 }
 0x57d   :  { %4488 = vmatpush3.bf16.msra.mxu0 %v4485_v29 }
 0x57e   :  { %4490 = vmatprep.subr.bf16.mxu0 %v4489_v14 }
 0x581   :  { %4492 = vmatpush3.bf16.msra.mxu0 %v4489_v14 }
 0x59a   :  { %v2510_v15 = vpop.xlane.xlu1 %2509 }
 0x59b   :  { %4662 = vrcp.f32 %v2510_v15 }
 0x5a5   :  { %v4663_v17 = vpop.eup %4662 }
 0x5a6   :  { %v2542_v18 = vmul.f32 %v4663_v17, %v5845_v2  ;;  %v4493_v2 = vpack.c.bf16 %v3719_v28, %v3718_v47 }
 0x5a8   :  { %4284 = vmatmul.mubr.msk.f32.vlgmr.msra.gmra.mrb[54].mxu1 %vm2543_vm2, %v2542_v18  ;;  %4494 = vmatprep.subr.bf16.mxu0 %v4493_v2 }
 0x5a9   :  { %4496 = vmatpush3.bf16.msra.mxu0 %v4493_v2 }
 0x5aa   :  { %4498 = vmatprep.subr.bf16.mxu0 %v4497_v59 }
 0x5ad   :  { %4500 = vmatpush3.bf16.msra.mxu0 %v4497_v59 }
 0x5ae   :  { %4502 = vmatprep.subr.bf16.mxu0 %v4501_v1 }
 0x5b1   :  { %4504 = vmatpush3.bf16.msra.mxu0 %v4501_v1 }
 0x5b2   :  { %v2613_v42 = vpop.f32.mrb[34].mxu1  ;;  %4506 = vmatprep.subr.bf16.mxu0 %v4505_v32 }
 0x5b3   :  { %v4180_v11 = vpop.f32.mrb[35].mxu1 }
 0x5b5   :  { %4508 = vmatpush3.bf16.msra.mxu0 %v4505_v32 }
 0x5b6   :  { %4510 = vmatprep.subr.bf16.mxu0 %v4509_v20 }
 0x5b9   :  { %4512 = vmatpush3.bf16.msra.mxu0 %v4509_v20 }
 0x5e2   :  { %v2686_v48 = vpop.f32.mrb[36].mxu1 }
 0x5e3   :  { %v3744_v35 = vrot.slane %v2686_v48, 7  ;;  %v4187_v26 = vpop.f32.mrb[37].mxu1 }
 0x5e5   :  { %v3746_v37 = vsel %vm3745_vm3, %v3744_v35, %v2613_v42 }
 0x5e6   :  { %v2759_v43 = vpop.f32.mrb[38].mxu1 }
 0x5e7   :  { %v3747_v50 = vrot.slane %v2759_v43, 6  ;;  %v4194_v22 = vpop.f32.mrb[39].mxu1 }
 0x5e9   :  { %v3749_v54 = vsel %vm3748_vm4, %v3747_v50, %v3746_v37 }
 0x5ea   :  { %v2832_v13 = vpop.f32.mrb[40].mxu1 }
 0x5eb   :  { %v3750_v24 = vrot.slane %v2832_v13, 5  ;;  %v4201_v25 = vpop.f32.mrb[41].mxu1 }
 0x5ed   :  { %v3752_v12 = vsel %vm3751_vm5, %v3750_v24, %v3749_v54 }
 0x5fb   :  { %v2905_v60 = vpop.f32.mrb[42].mxu1 }
 0x5fc   :  { %v3753_v45 = vrot.slane %v2905_v60, 4  ;;  %v4208_v31 = vpop.f32.mrb[43].mxu1 }
 0x5fe   :  { %v3755_v23 = vsel %vm3754_vm6, %v3753_v45, %v3752_v12 }
 0x603   :  { %v2978_v39 = vpop.f32.mrb[44].mxu1 }
 0x604   :  { %v3756_v44 = vrot.slane %v2978_v39, 3  ;;  %v4215_v40 = vpop.f32.mrb[45].mxu1 }
 0x606   :  { %v3758_v58 = vsel %vm3757_vm7, %v3756_v44, %v3755_v23 }
 0x60b   :  { %v3051_v46 = vpop.f32.mrb[64].mxu0 }
 0x60c   :  { %v3759_v36 = vrot.slane %v3051_v46, 2  ;;  %v4222_v0 = vpop.f32.mrb[65].mxu0 }
 0x60e   :  { %v3761_v6 = vsel %vm3760_vm8, %v3759_v36, %v3758_v58 }
 0x613   :  { %v3124_v34 = vpop.f32.mrb[46].mxu1 }
 0x614   :  { %v3762_v57 = vrot.slane %v3124_v34, 1  ;;  %v4229_v10 = vpop.f32.mrb[47].mxu1 }
 0x616   :  { %v3764_v38 = vsel %vm3763_vm9, %v3762_v57, %v3761_v6 }
 0x617   :  { %4318 = vmatprep.mubr.f32.mxu0 %v3764_v38 }
 0x61b   :  { %v3197_v16 = vpop.f32.mrb[66].mxu0 }
 0x61c   :  { %v4236_v4 = vpop.f32.mrb[67].mxu0 }
 0x623   :  { %v3270_v19 = vpop.f32.mrb[48].mxu1 }
 0x624   :  { %v3765_v41 = vrot.slane %v3270_v19, 7  ;;  %v4243_v62 = vpop.f32.mrb[49].mxu1 }
 0x626   :  { %v3766_v7 = vsel %vm3745_vm3, %v3765_v41, %v3197_v16 }
 0x62b   :  { %v3343_v8 = vpop.f32.mrb[68].mxu0 }
 0x62c   :  { %v3767_v15 = vrot.slane %v3343_v8, 6  ;;  %v4250_v17 = vpop.f32.mrb[69].mxu0 }
 0x62e   :  { %v3768_v18 = vsel %vm3748_vm4, %v3767_v15, %v3766_v7 }
 0x633   :  { %v3416_v42 = vpop.f32.mrb[50].mxu1 }
 0x634   :  { %v3769_v11 = vrot.slane %v3416_v42, 5  ;;  %v4257_v63 = vpop.f32.mrb[51].mxu1 }
 0x636   :  { %v3770_v9 = vsel %vm3751_vm5, %v3769_v11, %v3768_v18 }
 0x63b   :  { %v3489_v5 = vpop.f32.mrb[70].mxu0 }
 0x63c   :  { %v3771_v51 = vrot.slane %v3489_v5, 4  ;;  %v4264_v61 = vpop.f32.mrb[71].mxu0 }
 0x63e   :  { %v3772_v29 = vsel %vm3754_vm6, %v3771_v51, %v3770_v9 }
 0x643   :  { %v3562_v52 = vpop.f32.mrb[52].mxu1 }
 0x644   :  { %v3773_v56 = vrot.slane %v3562_v52, 3  ;;  %v4271_v14 = vpop.f32.mrb[53].mxu1 }
 0x646   :  { %v3774_v47 = vsel %vm3757_vm7, %v3773_v56, %v3772_v29 }
 0x64b   :  { %v3635_v28 = vpop.f32.mrb[72].mxu0 }
 0x64c   :  { %v3775_v2 = vrot.slane %v3635_v28, 2  ;;  %v4278_v53 = vpop.f32.mrb[73].mxu0 }
 0x64e   :  { %v3776_v27 = vsel %vm3760_vm8, %v3775_v2, %v3774_v47 }
 0x67b   :  { %v3708_v59 = vpop.f32.mrb[54].mxu1 }
 0x67c   :  { %v3777_v33 = vrot.slane %v3708_v59, 1  ;;  %v4285_v49 = vpop.f32.mrb[55].mxu1 }
 0x67e   :  { %v3778_v1 = vsel %vm3763_vm9, %v3777_v33, %v3776_v27 }
 0x67f   :  { %4319 = vmatmul.mubr.f32.vlgmr.msra.gmra.mrb[74].mxu0 %v3778_v1 }
 0x752   :  { %v4320_v21 = vpop.f32.mrb[74].mxu0 }
 0x753   :  { %3857 = vst [vmem:[#allocation17 + $0x8] sm:$0xff] %v4320_v21  ;;  %v3847_v55 = vpop.f32.mrb[75].mxu0 }
 0x754   :  { %3856 = vst [vmem:[#allocation17] sm:$0xff] %v3847_v55 }
 0x755   :  { %4873 = shalt.err (!%p4870_p6)
}
 0x756   :  { %s4874_s30 = scalar_lea.hbm %s5993_s9, 256 }
 0x757   :  { %p4875_p7 = scmp.ne.s32.totalorder %s5993_s9, %s4874_s30  ;;  %p4878_p8 = scmp.lt.u32.totalorder %s4874_s30, %s5993_s9 }
 0x759   :  { %p4880_p9 = pnand %p4878_p8, %p4875_p7 }
 0x75b   :  { %4883 = shalt.err (!%p4880_p9)
}
 0x75c   :  { %3869 = dma.vmem_to_hbm [thread:$0]  %s3864_s7, 256, %s5993_s9, [#allocation4], %s4898_s21, %s4898_s21, %s4899_s22  }
 0x75d   :  { %4894 = dma.done.wait [#allocation4], 256  }
 0x75e   :  { %4895 = vsyncadd [#allocation4], 4294967040 }
 0x75f   :  { %3873 = vsyncpa [#allocation3], 1 }
 0x760   :  { %3874 = vsyncpa [#allocation6], 1 }
 0x761   :  { %3875 = vsyncpa [#allocation9], 1 }
 0x762   :  { %3876 = vsyncpa [#allocation12], 1 }
 0x763   :  { %3877 = vsyncpa [#allocation15], 1 }
 0x764   :  { %3878 = vsyncpa [#allocation4], 1 }

</bundles_post_ra>
